<compile_context>
chip_gen: v7x
topology: tpu7x:2x2x1
jax: 0.10.0
libtpu: 0.0.40
codegen_flags: <defaults>
</compile_context>

<pallas_src>
import jax
import jax.numpy as jnp
from jax.experimental import pallas as pl
from jax.experimental.pallas import tpu as pltpu


def _round_up(a, b):
    return ((a + b - 1) // b) * b


def _cdiv(a, b):
    return (a + b - 1) // b


# --------------------------------------------------------------------------- #
# Kernels
# --------------------------------------------------------------------------- #
def _mlp_resident_kernel(x_ref, w1_ref, b1_ref, w2_ref, b2_ref, w3_ref, b3_ref,
                         o_ref):
    # In-kernel bf16 cast of x (VPU cast hidden under the MXU).
    x = x_ref[...].astype(jnp.bfloat16)
    # Layer 1: Linear (bf16 MXU, f32 acc) + bias + Tanh (f32).
    h1 = jnp.tanh(
        jnp.dot(x, w1_ref[...], preferred_element_type=jnp.float32) + b1_ref[...]
    )
    # Layer 2: Linear + Tanh.  (Dropout = identity at inference.)
    h2 = jnp.tanh(
        jnp.dot(h1.astype(jnp.bfloat16), w2_ref[...],
                preferred_element_type=jnp.float32) + b2_ref[...]
    )
    # Layer 3: final projection (no final_activation); columns padded to 128 lanes.
    out = (
        jnp.dot(h2.astype(jnp.bfloat16), w3_ref[...],
                preferred_element_type=jnp.float32) + b3_ref[...]
    )
    o_ref[...] = out.astype(o_ref.dtype)


def _mlp_streamed_kernel(x_ref, w1_ref, b1_ref, w2_ref, b2_ref, w3_ref, b3_ref,
                         o_ref, acc_ref):
    # Trailing "arbitrary" grid axis streams w1 over K chunks; layer-1 output
    # accumulates in an f32 VMEM scratch.  Layers 2/3 run on the last chunk.
    k = pl.program_id(1)

    @pl.when(k == 0)
    def _():
        acc_ref[...] = jnp.zeros_like(acc_ref)

    acc_ref[...] += jnp.dot(
        x_ref[...].astype(jnp.bfloat16), w1_ref[...],
        preferred_element_type=jnp.float32)

    @pl.when(k == pl.num_programs(1) - 1)
    def _():
        h1 = jnp.tanh(acc_ref[...] + b1_ref[...])
        h2 = jnp.tanh(
            jnp.dot(h1.astype(jnp.bfloat16), w2_ref[...],
                    preferred_element_type=jnp.float32) + b2_ref[...]
        )
        out = (
            jnp.dot(h2.astype(jnp.bfloat16), w3_ref[...],
                    preferred_element_type=jnp.float32) + b3_ref[...]
        )
        o_ref[...] = out.astype(o_ref.dtype)


# --------------------------------------------------------------------------- #
# pallas_call builders
# --------------------------------------------------------------------------- #
def _vmem_whole():
    # Whole array, VMEM-resident for the duration of the call (single-buffered).
    return pl.BlockSpec(memory_space=pltpu.MemorySpace.VMEM)


def _call_resident(*, bt, Bp, in_pad, out_pad, vmem_limit, cost):
    return pl.pallas_call(
        _mlp_resident_kernel,
        out_shape=jax.ShapeDtypeStruct((Bp, out_pad), jnp.float32),
        grid_spec=pltpu.PrefetchScalarGridSpec(
            num_scalar_prefetch=0,
            grid=(Bp // bt,),
            in_specs=[
                pl.BlockSpec((bt, in_pad), lambda i: (i, 0)),   # x tile (f32)
                _vmem_whole(),   # w1 (bf16)
                _vmem_whole(),   # b1 (f32)
                _vmem_whole(),   # w2 (bf16)
                _vmem_whole(),   # b2 (f32)
                _vmem_whole(),   # w3 (bf16)
                _vmem_whole(),   # b3 (f32)
            ],
            out_specs=pl.BlockSpec((bt, out_pad), lambda i: (i, 0)),
        ),
        compiler_params=pltpu.CompilerParams(
            dimension_semantics=("parallel",),
            vmem_limit_bytes=vmem_limit,
        ),
        cost_estimate=cost,
    )


def _call_streamed(*, bt, kt, Bp, in_pad, h0, out_pad, vmem_limit, cost):
    n_k = in_pad // kt
    return pl.pallas_call(
        _mlp_streamed_kernel,
        out_shape=jax.ShapeDtypeStruct((Bp, out_pad), jnp.float32),
        grid_spec=pltpu.PrefetchScalarGridSpec(
            num_scalar_prefetch=0,
            grid=(Bp // bt, n_k),
            in_specs=[
                pl.BlockSpec((bt, kt), lambda i, k: (i, k)),    # x K-chunk (f32)
                pl.BlockSpec((kt, h0), lambda i, k: (k, 0)),    # w1 K-chunk (bf16)
                _vmem_whole(),   # b1
                _vmem_whole(),   # w2
                _vmem_whole(),   # b2
                _vmem_whole(),   # w3
                _vmem_whole(),   # b3
            ],
            out_specs=pl.BlockSpec((bt, out_pad), lambda i, k: (i, 0)),
            scratch_shapes=[pltpu.VMEM((bt, h0), jnp.float32)],
        ),
        compiler_params=pltpu.CompilerParams(
            dimension_semantics=("parallel", "arbitrary"),
            vmem_limit_bytes=vmem_limit,
        ),
        cost_estimate=cost,
    )


# --------------------------------------------------------------------------- #
# Wrapper
# --------------------------------------------------------------------------- #
def _vmem_limit_bytes():
    # Per-generation VMEM budget with 1/8 headroom for compiler scratch.
    # (narrow, tuning-only fallback: the query is just a knob, not correctness)
    cap = 64 * 1024 * 1024
    try:
        cap = int(pltpu.get_tpu_info().vmem_capacity_bytes)
    except Exception:  # pragma: no cover
        pass
    return cap - cap // 8


def _pick_batch_tile(B, batch_tile):
    bt = max(8, min(_round_up(batch_tile, 8), _round_up(B, 8)))
    # Guarantee >=2 "parallel" grid steps when the batch allows it, so both
    # v7x TensorCores get work and x/out DMA pipelines across steps.
    if B > 8 and _cdiv(B, bt) < 2:
        bt = max(8, _round_up(_cdiv(B, 2), 8))
    return bt


def prepare_ff_params(params, *, k_chunk=512):
    """One-time weight preparation: bf16 cast + lane/K zero padding (cache the result)."""
    w1, b1 = params["w1"], params["b1"]
    w2, b2 = params["w2"], params["b2"]
    w3, b3 = params["w3"], params["b3"]
    in_dim, h0 = w1.shape
    h1d = w2.shape[1]
    out_dim = w3.shape[1]

    out_pad = _round_up(out_dim, 128)          # lane-dense unmasked stores
    in_pad = _round_up(in_dim, 128)
    kt = _round_up(min(k_chunk, in_pad), 128)  # K-chunk for the streamed path
    in_pad = _round_up(in_pad, kt)

    if in_pad != in_dim:
        w1 = jnp.pad(w1, ((0, in_pad - in_dim), (0, 0)))
    if out_pad != out_dim:
        w3 = jnp.pad(w3, ((0, 0), (0, out_pad - out_dim)))
        b3 = jnp.pad(b3, ((0, 0), (0, out_pad - out_dim)))

    return dict(
        w1=w1.astype(jnp.bfloat16), b1=b1.astype(jnp.float32),
        w2=w2.astype(jnp.bfloat16), b2=b2.astype(jnp.float32),
        w3=w3.astype(jnp.bfloat16), b3=b3.astype(jnp.float32),
        meta=dict(in_dim=in_dim, in_pad=in_pad, kt=kt, h0=h0, h1d=h1d,
                  out_dim=out_dim, out_pad=out_pad),
    )


def feedforward_pallas(x, prepared, *, batch_tile=128, weights_resident=None):
    """x: [B, in_dim] float32.  prepared: output of prepare_ff_params()."""
    meta = prepared["meta"]
    in_dim, in_pad, kt = meta["in_dim"], meta["in_pad"], meta["kt"]
    h0, h1d = meta["h0"], meta["h1d"]
    out_dim, out_pad = meta["out_dim"], meta["out_pad"]
    w1, b1 = prepared["w1"], prepared["b1"]
    w2, b2 = prepared["w2"], prepared["b2"]
    w3, b3 = prepared["w3"], prepared["b3"]

    B = x.shape[0]
    assert x.shape[1] == in_dim

    bt = _pick_batch_tile(B, batch_tile)
    Bp = _round_up(B, bt)
    if (Bp, in_pad) != (B, in_dim):
        x = jnp.pad(x, ((0, Bp - B), (0, in_pad - in_dim)))

    vmem_limit = _vmem_limit_bytes()
    if weights_resident is None:
        weight_bytes = sum(int(a.size) * a.dtype.itemsize
                           for a in (w1, b1, w2, b2, w3, b3))
        # Resident only when weights leave comfortable headroom for the
        # x/out double-buffers, intermediates, and compiler scratch.
        weights_resident = weight_bytes <= int(0.6 * vmem_limit)

    flops = 2 * Bp * (in_pad * h0 + h0 * h1d + h1d * out_pad)
    transcendentals = Bp * (h0 + h1d)
    bytes_accessed = (
        4 * Bp * in_pad                                    # f32 x read
        + 2 * (in_pad * h0 + h0 * h1d + h1d * out_pad)     # bf16 weights
        + 4 * (h0 + h1d + out_pad)                         # f32 biases
        + 4 * Bp * out_pad                                 # f32 output write
    )
    cost = pl.CostEstimate(flops=int(flops), transcendentals=int(transcendentals),
                           bytes_accessed=int(bytes_accessed))

    if weights_resident:
        call = _call_resident(bt=bt, Bp=Bp, in_pad=in_pad, out_pad=out_pad,
                              vmem_limit=vmem_limit, cost=cost)
    else:
        call = _call_streamed(bt=bt, kt=kt, Bp=Bp, in_pad=in_pad, h0=h0,
                              out_pad=out_pad, vmem_limit=vmem_limit, cost=cost)

    out = call(x, w1, b1, w2, b2, w3, b3)
    return out[:B, :out_dim]


# --------------------------------------------------------------------------- #
# Reference / init
# --------------------------------------------------------------------------- #
def init_params(key, in_dim, hidden_sizes, out_dim):
    """Deterministic PyTorch-Linear-style init (uniform +/- 1/sqrt(fan_in))."""
    dims = [in_dim] + list(hidden_sizes) + [out_dim]
    params = {}
    for n, (d_in, d_out) in zip(["1", "2", "3"], zip(dims[:-1], dims[1:])):
        key, kw, kb = jax.random.split(key, 3)
        bound = 1.0 / (d_in ** 0.5)
        # stored transposed relative to PyTorch: [in, out]
        params[f"w{n}"] = jax.random.uniform(kw, (d_in, d_out), jnp.float32,
                                             -bound, bound)
        params[f"b{n}"] = jax.random.uniform(kb, (1, d_out), jnp.float32,
                                             -bound, bound)
    return params


def feedforward_reference(x, params):
    """Plain-JAX reference with the same bf16 matmul-input rounding as the kernel."""
    c = lambda a: a.astype(jnp.bfloat16)
    h1 = jnp.tanh(jnp.dot(c(x), c(params["w1"]),
                          preferred_element_type=jnp.float32) + params["b1"])
    h2 = jnp.tanh(jnp.dot(c(h1), c(params["w2"]),
                          preferred_element_type=jnp.float32) + params["b2"])
    return jnp.dot(c(h2), c(params["w3"]),
                   preferred_element_type=jnp.float32) + params["b3"]


if __name__ == "__main__":
    # Small shapes consistent with the module (scaled-down hidden_sizes).
    # B deliberately NOT a multiple of the tile to exercise batch padding;
    # IN_DIM=384 with k_chunk=128 exercises the K-streamed accumulator path.
    B, IN_DIM, OUT_DIM = 200, 384, 1
    HIDDEN_SIZES = [256, 128]   # stands in for the default [3072, 1024]

    key = jax.random.PRNGKey(0)
    key, kx = jax.random.split(key)
    x = jax.random.normal(kx, (B, IN_DIM), jnp.float32)
    params = init_params(key, IN_DIM, HIDDEN_SIZES, OUT_DIM)

    ref = feedforward_reference(x, params)

    # Path 1: VMEM-resident weights (default at these sizes).
    prep = prepare_ff_params(params)
    out_res = jax.block_until_ready(
        feedforward_pallas(x, prep, batch_tile=128, weights_resident=True))

    # Path 2: w1 streamed over K chunks (forced, with 3 K-chunks of 128).
    prep_s = prepare_ff_params(params, k_chunk=128)
    out_str = jax.block_until_ready(
        feedforward_pallas(x, prep_s, batch_tile=128, weights_resident=False))

    for out in (out_res, out_str):
        assert out.shape == (B, OUT_DIM)
        max_err = float(jnp.max(jnp.abs(out - ref)))
        assert jnp.allclose(out, ref, atol=1e-2, rtol=1e-2), \
            f"mismatch vs reference: {max_err}"

    print("KERNEL_OK")
</pallas_src>

<mosaic_0001>
module attributes {stable_mosaic.version = 11 : i64} {
  func.func @_mlp_resident_kernel(%arg0: i32, %arg1: memref<128x384xf32, #tpu.memory_space<vmem>>, %arg2: memref<384x256xbf16, #tpu.memory_space<vmem>>, %arg3: memref<1x256xf32, #tpu.memory_space<vmem>>, %arg4: memref<256x128xbf16, #tpu.memory_space<vmem>>, %arg5: memref<1x128xf32, #tpu.memory_space<vmem>>, %arg6: memref<128x128xbf16, #tpu.memory_space<vmem>>, %arg7: memref<1x128xf32, #tpu.memory_space<vmem>>, %arg8: memref<128x128xf32, #tpu.memory_space<vmem>>) attributes {dimension_semantics = [#tpu.dimension_semantics<parallel>], iteration_bounds = array<i64: 2>, scalar_prefetch = 0 : i64, scratch_operands = 0 : i64, tpu.core_type = #tpu.core_type<tc>, window_params = [{transform_indices = @transform_0, window_bounds = array<i64: 128, 384>}, {pipeline_mode = #tpu.pipeline_mode<synchronous>, transform_indices = @transform_1, window_bounds = array<i64: 384, 256>}, {pipeline_mode = #tpu.pipeline_mode<synchronous>, transform_indices = @transform_2, window_bounds = array<i64: 1, 256>}, {pipeline_mode = #tpu.pipeline_mode<synchronous>, transform_indices = @transform_3, window_bounds = array<i64: 256, 128>}, {pipeline_mode = #tpu.pipeline_mode<synchronous>, transform_indices = @transform_4, window_bounds = array<i64: 1, 128>}, {pipeline_mode = #tpu.pipeline_mode<synchronous>, transform_indices = @transform_5, window_bounds = array<i64: 128, 128>}, {pipeline_mode = #tpu.pipeline_mode<synchronous>, transform_indices = @transform_6, window_bounds = array<i64: 1, 128>}, {transform_indices = @transform_7, window_bounds = array<i64: 128, 128>}]} {
    %c0 = arith.constant 0 : index
    %c0_0 = arith.constant 0 : index
    %0 = vector.load %arg1[%c0, %c0_0] : memref<128x384xf32, #tpu.memory_space<vmem>>, vector<128x384xf32>
    %1 = arith.truncf %0 : vector<128x384xf32> to vector<128x384xbf16>
    %c0_1 = arith.constant 0 : index
    %c0_2 = arith.constant 0 : index
    %2 = vector.load %arg2[%c0_1, %c0_2] : memref<384x256xbf16, #tpu.memory_space<vmem>>, vector<384x256xbf16>
    %cst = arith.constant dense<0.000000e+00> : vector<128x256xf32>
    %3 = tpu.matmul %1, %2, %cst {dimension_numbers = #tpu.dot_dimension_numbers<[1], [0], [0], [1], [0, 0, 1, 1], [], []>} : vector<128x384xbf16>, vector<384x256xbf16>, vector<128x256xf32> -> vector<128x256xf32>
    %c0_3 = arith.constant 0 : index
    %c0_4 = arith.constant 0 : index
    %4 = vector.load %arg3[%c0_3, %c0_4] : memref<1x256xf32, #tpu.memory_space<vmem>>, vector<1x256xf32>
    %5 = vector.broadcast %4 : vector<1x256xf32> to vector<128x256xf32>
    %6 = arith.addf %3, %5 : vector<128x256xf32>
    %7 = math.tanh %6 : vector<128x256xf32>
    %8 = arith.truncf %7 : vector<128x256xf32> to vector<128x256xbf16>
    %c0_5 = arith.constant 0 : index
    %c0_6 = arith.constant 0 : index
    %9 = vector.load %arg4[%c0_5, %c0_6] : memref<256x128xbf16, #tpu.memory_space<vmem>>, vector<256x128xbf16>
    %cst_7 = arith.constant dense<0.000000e+00> : vector<128x128xf32>
    %10 = tpu.matmul %8, %9, %cst_7 {dimension_numbers = #tpu.dot_dimension_numbers<[1], [0], [0], [1], [0, 0, 1, 1], [], []>} : vector<128x256xbf16>, vector<256x128xbf16>, vector<128x128xf32> -> vector<128x128xf32>
    %c0_8 = arith.constant 0 : index
    %c0_9 = arith.constant 0 : index
    %11 = vector.load %arg5[%c0_8, %c0_9] : memref<1x128xf32, #tpu.memory_space<vmem>>, vector<1x128xf32>
    %12 = vector.broadcast %11 : vector<1x128xf32> to vector<128x128xf32>
    %13 = arith.addf %10, %12 : vector<128x128xf32>
    %14 = math.tanh %13 : vector<128x128xf32>
    %15 = arith.truncf %14 : vector<128x128xf32> to vector<128x128xbf16>
    %c0_10 = arith.constant 0 : index
    %c0_11 = arith.constant 0 : index
    %16 = vector.load %arg6[%c0_10, %c0_11] : memref<128x128xbf16, #tpu.memory_space<vmem>>, vector<128x128xbf16>
    %cst_12 = arith.constant dense<0.000000e+00> : vector<128x128xf32>
    %17 = tpu.matmul %15, %16, %cst_12 {dimension_numbers = #tpu.dot_dimension_numbers<[1], [0], [0], [1], [0, 0, 1, 1], [], []>} : vector<128x128xbf16>, vector<128x128xbf16>, vector<128x128xf32> -> vector<128x128xf32>
    %c0_13 = arith.constant 0 : index
    %c0_14 = arith.constant 0 : index
    %18 = vector.load %arg7[%c0_13, %c0_14] : memref<1x128xf32, #tpu.memory_space<vmem>>, vector<1x128xf32>
    %19 = vector.broadcast %18 : vector<1x128xf32> to vector<128x128xf32>
    %20 = arith.addf %17, %19 : vector<128x128xf32>
    %c0_15 = arith.constant 0 : index
    %c0_16 = arith.constant 0 : index
    %21 = vector.load %arg8[%c0_15, %c0_16] : memref<128x128xf32, #tpu.memory_space<vmem>>, vector<128x128xf32>
    tpu.vector_store %arg8[%c0_15, %c0_16], %20 {strides = array<i32>} : memref<128x128xf32, #tpu.memory_space<vmem>>, vector<128x128xf32>,
    return
  }
  func.func @transform_0(%arg0: i32) -> (i32, i32) {
    %c0_i32 = arith.constant 0 : i32
    %c0_i32_0 = arith.constant 0 : i32
    return %arg0, %c0_i32 : i32, i32
  }
  func.func @transform_1(%arg0: i32) -> (i32, i32) {
    %c0_i32 = arith.constant 0 : i32
    %c0_i32_0 = arith.constant 0 : i32
    %c0_i32_1 = arith.constant 0 : i32
    return %c0_i32, %c0_i32_0 : i32, i32
  }
  func.func @transform_2(%arg0: i32) -> (i32, i32) {
    %c0_i32 = arith.constant 0 : i32
    %c0_i32_0 = arith.constant 0 : i32
    %c0_i32_1 = arith.constant 0 : i32
    return %c0_i32, %c0_i32_0 : i32, i32
  }
  func.func @transform_3(%arg0: i32) -> (i32, i32) {
    %c0_i32 = arith.constant 0 : i32
    %c0_i32_0 = arith.constant 0 : i32
    %c0_i32_1 = arith.constant 0 : i32
    return %c0_i32, %c0_i32_0 : i32, i32
  }
  func.func @transform_4(%arg0: i32) -> (i32, i32) {
    %c0_i32 = arith.constant 0 : i32
    %c0_i32_0 = arith.constant 0 : i32
    %c0_i32_1 = arith.constant 0 : i32
    return %c0_i32, %c0_i32_0 : i32, i32
  }
  func.func @transform_5(%arg0: i32) -> (i32, i32) {
    %c0_i32 = arith.constant 0 : i32
    %c0_i32_0 = arith.constant 0 : i32
    %c0_i32_1 = arith.constant 0 : i32
    return %c0_i32, %c0_i32_0 : i32, i32
  }
  func.func @transform_6(%arg0: i32) -> (i32, i32) {
    %c0_i32 = arith.constant 0 : i32
    %c0_i32_0 = arith.constant 0 : i32
    %c0_i32_1 = arith.constant 0 : i32
    return %c0_i32, %c0_i32_0 : i32, i32
  }
  func.func @transform_7(%arg0: i32) -> (i32, i32) {
    %c0_i32 = arith.constant 0 : i32
    %c0_i32_0 = arith.constant 0 : i32
    return %arg0, %c0_i32 : i32, i32
  }
}

</mosaic_0001>

<bundles_post_ra>
// kernel: tpu_custom_call.1
= control target key start
LH: loop header
LB: loop body
LE: loop exit
PB: predicated region body
PF: predicated region fallthrough
CT: control target
= control target key end

     0   :  { %s2916_s0 = inlined_call_operand.hbm [shape: f32[256,384], index: 0, kind: input, shape index: {}]   ;;  %s2917_s1 = inlined_call_operand.hbm [shape: bf16[384,256], index: 1, kind: input, shape index: {}]   ;;  %s2918_s2 = inlined_call_operand.vmem [shape: f32[1,256], index: 2, kind: input, shape index: {}]   ;;  %s2919_s3 = inlined_call_operand.hbm [shape: bf16[256,128], index: 3, kind: input, shape index: {}]   ;;  %s2920_s4 = inlined_call_operand.vmem [shape: f32[1,128], index: 4, kind: input, shape index: {}]   ;;  %s2921_s5 = inlined_call_operand.hbm [shape: bf16[128,128], index: 5, kind: input, shape index: {}]   ;;  %s2922_s6 = inlined_call_operand.vmem [shape: f32[1,128], index: 6, kind: input, shape index: {}]   ;;  %s2923_s7 = inlined_call_operand.hbm [shape: f32[256,128], index: 7, kind: output, shape index: {}]  }
   0x1   :  { %2928 = sst [smem:[#allocation16_spill]] %s2917_s1 }
   0x2   :  { %12 = vsyncpa [#allocation3], 0 }
   0x3   :  { %14 = vsyncpa [#allocation3 + $0x1], 0 }
   0x4   :  { %15 = vsyncpa [#allocation6], 0 }
   0x5   :  { %16 = vsyncpa [#allocation9], 0 }
   0x6   :  { %17 = vsyncpa [#allocation4], 0 }
   0x7   :  { %19 = vsyncpa [#allocation4 + $0x1], 0  ;;  %s2358_s24 = smov 0   ;;  %s2360_s25 = smov 0  }
   0x8   :  { %s2362_s26 = smov 0   ;;  %s2364_s27 = smov 0  }
   0x9 LB: > { %s2379_s28 = sadd.s32 4294967295, %s2302_s27   ;;  %s1547_s29 = sadd.s32 4294967294, %s2302_s27   ;;  %s2302_s27 = sphi %s2364_s27, %s2951_s27   ;;  %s2298_s26 = sphi %s2362_s26, %s2950_s26   ;;  %s2294_s25 = sphi %s2360_s25, %s2949_s25   ;;  %s2290_s24 = sphi %s2358_s24, %s2948_s24  }
   0xa   : > { %p45_p0 = scmp.ne.s32.totalorder %s2294_s25, %s2290_s24  ;;  %p2924_p1 = scmp.eq.s32.totalorder %s2379_s28, 0 }
   0xb   : > { %p201_p3 = scmp.eq.s32.totalorder %s1547_s29, 1  ;;  %p1548_p5 = scmp.ge.s32.totalorder %s2302_s27, 1 }
   0xc   : > { %p2388_p4 = por %p2924_p1, %p45_p0  ;;  %p208_p7 = scmp.lt.s32.totalorder %s2302_s27, 3 }
   0xd   : > { %p2393_p6 = por %p201_p3, %p45_p0  ;;  %s2304_s10 = smov [#allocation5]  }
   0xe   : > { %s2929_s30 = scalar_select %p2388_p4, 1, 0 }
   0xf   : > { %s2930_s8 = scalar_select %p2393_p6, 1, 0 }
  0x10   : > { %p2398_p8 = pnand %p1548_p5, %p208_p7  ;;  %s220_s11 = sshll.u32 %s2304_s10, 4  ;;  %s2402_s11 = int_to_ptr.vmem [resolvable:$true] %s220_s11 }
  0x11   : > { %2931 = sst [smem:[#allocation15_spill]] %s2930_s8  ;;  %s2305_s13 = smov [#allocation7]  }
  0x12   : > { %s2932_s9 = scalar_select %p2398_p8, 1, 0 }
  0x13   : > { %p1852_p9 = pneg %p2398_p8  ;;  %s236_s14 = sshll.u32 %s2305_s13, 4  ;;  %s2413_s14 = int_to_ptr.vmem [resolvable:$true] %s236_s14 }
  0x14   : > { %s2934_s1 = sld [smem:[#allocation16_spill]] }
  0x15   : > { %p2409_p11 = pnand %p1852_p9, %p2924_p1 }
  0x17   : > { %p2423_p13 = pneg %p2409_p11 }
  0x1a   : > { %s2114_s17 = scalar_lea.hbm %s2934_s1, 6144 }
  0x1b   : > { %p2115_p12 = scmp.ne.s32.totalorder %s2934_s1, %s2114_s17  ;;  %p2121_p5 = scmp.lt.u32.totalorder %s2114_s17, %s2934_s1 }
  0x1d   : > { %p2117_p0 = pnand %p2423_p13, %p2115_p12 }
  0x1f   : > { %p2118_p3 = pneg %p2117_p0 }
  0x21   : > { %p2123_p7 = pnand %p2121_p5, %p2118_p3 }
  0x23   : > { %2126 = shalt.err (!%p2123_p7)
}
  0x24   : > { %s2127_s23 = scalar_lea.vmem %s2402_s11, 6144  ;;  %p2135_p2 = scmp.lt.s32.totalorder %s2402_s11, %s2402_s11 }
  0x25   : > { %p2128_p9 = scmp.ne.s32.totalorder %s2402_s11, %s2127_s23  ;;  %p2136_p6 = scmp.lt.s32.totalorder %s2127_s23, %s2127_s23 }
  0x27   : > { %p2130_p10 = pnand %p2128_p9, %p2423_p13  ;;  %p2137_p12 = por %p2136_p6, %p2135_p2 }
  0x29   : > { %p2131_p1 = pneg %p2130_p10 }
  0x2b   : > { %p2138_p0 = pnand %p2137_p12, %p2131_p1 }
  0x2d   : > { %2141 = shalt.err (!%p2138_p0)
}
  0x2e   : > { %s2306_s29 = smov 128   ;;  %s2307_s10 = smov 8  }
  0x2f   : > { %1855 = dma.hbm_to_vmem [thread:$0]  (!%p2409_p11), %s2934_s1, 6144, %s2402_s11, [#allocation6], %s2306_s29, %s2306_s29, %s2307_s10  }
  0x30   : > { %s2142_s18 = scalar_lea.hbm %s2919_s3, 2048 }
  0x31   : > { %p2143_p2 = scmp.ne.s32.totalorder %s2919_s3, %s2142_s18  ;;  %p2149_p10 = scmp.lt.u32.totalorder %s2142_s18, %s2919_s3 }
  0x33   : > { %p2145_p1 = pnand %p2143_p2, %p2423_p13 }
  0x35   : > { %p2146_p6 = pneg %p2145_p1 }
  0x37   : > { %p2151_p3 = pnand %p2149_p10, %p2146_p6 }
  0x39   : > { %2154 = shalt.err (!%p2151_p3)
}
  0x3a   : > { %s2155_s11 = scalar_lea.vmem %s2413_s14, 2048  ;;  %p2163_p12 = scmp.lt.s32.totalorder %s2413_s14, %s2413_s14 }
  0x3b   : > { %p2156_p5 = scmp.ne.s32.totalorder %s2413_s14, %s2155_s11  ;;  %p2164_p0 = scmp.lt.s32.totalorder %s2155_s11, %s2155_s11 }
  0x3d   : > { %p2158_p7 = pnand %p2156_p5, %p2423_p13  ;;  %p2165_p2 = por %p2164_p0, %p2163_p12 }
  0x3f   : > { %p2159_p9 = pneg %p2158_p7 }
  0x41   : > { %p2166_p1 = pnand %p2165_p2, %p2159_p9 }
  0x43   : > { %2169 = shalt.err (!%p2166_p1)
}
  0x44   : > { %s2308_s29 = smov 64   ;;  %s2309_s10 = smov 4  }
  0x45   : > { %1858 = dma.hbm_to_vmem [thread:$0]  (!%p2409_p11), %s2919_s3, 2048, %s2413_s14, [#allocation6], %s2308_s29, %s2308_s29, %s2309_s10  }
  0x46   : > { %s2310_s16 = smov [#allocation8]   ;;  %s2468_s18 = sadd.s32 1, %s2302_s27  }
  0x47   : > { %s252_s17 = sshll.u32 %s2310_s16, 4  ;;  %s2170_s22 = scalar_lea.hbm %s2921_s5, 1024  ;;  %s253_s17 = int_to_ptr.vmem [resolvable:$true] %s252_s17 }
  0x48   : > { %p2171_p6 = scmp.ne.s32.totalorder %s2921_s5, %s2170_s22  ;;  %p2177_p5 = scmp.lt.u32.totalorder %s2170_s22, %s2921_s5 }
  0x4a   : > { %p2173_p10 = pnand %p2171_p6, %p2423_p13 }
  0x4c   : > { %p2174_p3 = pneg %p2173_p10 }
  0x4e   : > { %p2179_p7 = pnand %p2177_p5, %p2174_p3 }
  0x50   : > { %2182 = shalt.err (!%p2179_p7)
}
  0x51   : > { %s2183_s14 = scalar_lea.vmem %s253_s17, 1024  ;;  %p2191_p2 = scmp.lt.s32.totalorder %s253_s17, %s253_s17 }
  0x52   : > { %p2184_p9 = scmp.ne.s32.totalorder %s253_s17, %s2183_s14  ;;  %p2192_p1 = scmp.lt.s32.totalorder %s2183_s14, %s2183_s14 }
  0x54   : > { %p2186_p12 = pnand %p2184_p9, %p2423_p13  ;;  %p2193_p4 = por %p2192_p1, %p2191_p2 }
  0x56   : > { %p2187_p0 = pneg %p2186_p12 }
  0x58   : > { %p2194_p8 = pnand %p2193_p4, %p2187_p0 }
  0x5a   : > { %2197 = shalt.err (!%p2194_p8)
}
  0x5b   : > { %1861 = dma.hbm_to_vmem [thread:$0]  (!%p2409_p11), %s2921_s5, 1024, %s253_s17, [#allocation9], %s2308_s29, %s2308_s29, %s2309_s10  }
  0x5c   : > { %s29_s1 = ssub.s32 %s2302_s27, %s2468_s18  ;;  %s32_s8 = sadd.s32 1, %s2298_s26 }
  0x5d   : > { %p30_p4 = scmp.eq.s32.totalorder %s29_s1, 0  ;;  %p39_p8 = scmp.ne.s32.totalorder %s2298_s26, %s2294_s25 }
  0x5e   : > { %p40_p13 = scmp.eq.s32.totalorder %s2302_s27, 0  ;;  %p1873_p6 = scmp.lt.s32.totalorder %s2302_s27, 2 }
  0x5f   : > { %s2496_s12 = scalar_select %p30_p4, %s2298_s26, %s32_s8  }
  0x60   : > { %p41_p10 = por %p40_p13, %p39_p8  ;;  %p2936_p3 = scmp.eq.s32.totalorder %s2379_s28, 1 }
  0x61   : > { %s269_s16 = sand.u32 1, %s2298_s26   ;;  %s1834_s19 = smul.u32 6144, %s2302_s27 }
  0x62   : > { %p2500_p5 = por %p2936_p3, %p39_p8  ;;  %s1833_s21 = smul.u32 384, %s269_s16 }
  0x63   : > { %s2509_s29 = scalar_lea.hbm %s2916_s0, %s1834_s19  ;;  %p2511_p11 = pnand %p1873_p6, %p41_p10 }
  0x64   : > { %s273_s17 = scalar_lea.vmem [#allocation2], %s1833_s21  ;;  %s2517_s14 = scalar_lea.sflag [#allocation3], %s269_s16 }
  0x65   : > { %s281_s11 = sshll.u32 %s273_s17, 4  ;;  %s2198_s13 = scalar_lea.hbm %s2509_s29, 6144  ;;  %s2515_s11 = int_to_ptr.vmem [resolvable:$true] %s281_s11 }
  0x66   : > { %p2199_p7 = scmp.ne.s32.totalorder %s2509_s29, %s2198_s13  ;;  %p2200_p9 = pneg %p2511_p11 }
  0x67   : > { %s2203_s8 = scalar_lea.hbm %s2916_s0, 12288  ;;  %p2204_p2 = scmp.lt.u32.totalorder %s2509_s29, %s2916_s0 }
  0x68   : > { %p2201_p12 = pnand %p2200_p9, %p2199_p7  ;;  %p2205_p1 = scmp.lt.u32.totalorder %s2203_s8, %s2198_s13 }
  0x69   : > { %p2207_p8 = scmp.lt.u32.totalorder %s2198_s13, %s2509_s29 }
  0x6a   : > { %p2202_p0 = pneg %p2201_p12  ;;  %p2206_p4 = por %p2205_p1, %p2204_p2 }
  0x6c   : > { %p2208_p13 = por %p2207_p8, %p2206_p4 }
  0x6e   : > { %p2209_p6 = pnand %p2208_p13, %p2202_p0 }
  0x70   : > { %2212 = shalt.err (!%p2209_p6)
}
  0x71   : > { %s2213_s16 = scalar_lea.vmem %s2515_s11, 6144  ;;  %s2311_s21 = smov [#allocation2]  }
  0x72   : > { %p2214_p10 = scmp.ne.s32.totalorder %s2515_s11, %s2213_s16  ;;  %s2218_s23 = sshll.u32 %s2311_s21, 4  ;;  %s2219_s23 = int_to_ptr.vmem [resolvable:$false] %s2218_s23 }
  0x73   : > { %s2220_s17 = scalar_lea.vmem %s2219_s23, 12288  ;;  %p2221_p12 = scmp.lt.s32.totalorder %s2515_s11, %s2219_s23 }
  0x74   : > { %p2216_p3 = pnand %p2214_p10, %p2200_p9  ;;  %p2222_p2 = scmp.lt.s32.totalorder %s2220_s17, %s2213_s16 }
  0x76   : > { %p2217_p7 = pneg %p2216_p3  ;;  %p2223_p1 = por %p2222_p2, %p2221_p12 }
  0x78   : > { %p2224_p4 = pnand %p2223_p1, %p2217_p7 }
  0x7a   : > { %2227 = shalt.err (!%p2224_p4)
}
  0x7b   : > { %s2312_s13 = smov 384   ;;  %s2313_s15 = smov 24  }
  0x7c   : > { %1865 = dma.hbm_to_vmem [thread:$0]  (!%p2511_p11), %s2509_s29, 6144, %s2515_s11, %s2517_s14, %s2312_s13, %s2312_s13, %s2313_s15  }
  0x7d   : > { %p2939_p9 = scmp.ne.s32.totalorder %s2932_s9, 0 }
  0x7e   : > { %s2548_s1 = sand.u32 (!%p2939_p9), 1, %s2294_s25   ;;  %p2940_p0 = scmp.ne.s32.totalorder (!%p2939_p9), %s2929_s30, 0 }
  0x7f   : > { %293 = sbr.rel (%p2939_p9) target bundleno = 1022 (0x3fe), region = 48  ;;  %s296_s19 = scalar_lea.sflag (!%p2939_p9), [#allocation3], %s2548_s1 }
  0x80   : > { %s1835_s8 = smul.u32 (!%p2939_p9), 384, %s2548_s1 }
  0x82   : > { %s2552_s22 = scalar_lea.vmem (!%p2939_p9), [#allocation2], %s1835_s8 }
  0x86   : > { %2273 = dma.done.wait (%p2940_p0), %s296_s19, 6144  }
  0x87   : > { %2275 = vsyncadd (%p2940_p0), %s296_s19, 4294961152  ;;  %p2941_p11 = scmp.eq.s32.totalorder %s2379_s28, 0 }
  0x89   : > { %2277 = dma.done.wait (%p2941_p11), [#allocation6], 8192   ;;  %p2942_p8 = pmov %p2941_p11 }
  0x8b   : > { %2279 = vsyncadd (%p2942_p8), [#allocation6], 4294959104  ;;  %p2943_p13 = pmov %p2942_p8 }
  0x8c   : > { %p2944_p6 = pmov %p2942_p8 }
  0x8d   : > { %2281 = dma.done.wait (%p2943_p13), [#allocation9], 1024  }
  0x8e   : > { %2283 = vsyncadd (%p2944_p6), [#allocation9], 4294966272  ;;  %v2314_v0 = vmov 0   ;;  %v1922_v1 = vld [vmem:[#allocation5 + $0x4] ss:$8 sps:$4 sm:$0xff]   ;;  %v371_v47 = vld [vmem:[%s2552_s22 + $0xd0] sm:$0xff] }
  0x8f   : > { %902 = vmatprep.mubr.bf16.mxu1 %v2314_v0  ;;  %v1924_v2 = vld [vmem:[#allocation5] ss:$8 sps:$4 sm:$0xff]   ;;  %717 = vmatprep.subr.bf16.mxu0 %v1922_v1  ;;  %v1925_v3 = vld [vmem:[#allocation5 + $0x14] ss:$8 sps:$4 sm:$0xff]   ;;  %v1927_v4 = vld [vmem:[#allocation5 + $0x10] ss:$8 sps:$4 sm:$0xff]  }
  0x90   : > { %718 = vmatpush1.bf16.msra.mxu0 %v1924_v2  ;;  %v1928_v5 = vld [vmem:[#allocation5 + $0x24] ss:$8 sps:$4 sm:$0xff]   ;;  %v1930_v6 = vld [vmem:[#allocation5 + $0x20] ss:$8 sps:$4 sm:$0xff]   ;;  %v1931_v7 = vld [vmem:[#allocation5 + $0x34] ss:$8 sps:$4 sm:$0xff]  }
  0x91   : > { %719 = vmatprep.subr.bf16.mxu0 %v1925_v3  ;;  %v1933_v8 = vld [vmem:[#allocation5 + $0x30] ss:$8 sps:$4 sm:$0xff]   ;;  %v1934_v9 = vld [vmem:[#allocation5 + $0x44] ss:$8 sps:$4 sm:$0xff]   ;;  %v1936_v10 = vld [vmem:[#allocation5 + $0x40] ss:$8 sps:$4 sm:$0xff]  }
  0x92   : > { %v1937_v11 = vld [vmem:[#allocation5 + $0x54] ss:$8 sps:$4 sm:$0xff]   ;;  %v1939_v12 = vld [vmem:[#allocation5 + $0x50] ss:$8 sps:$4 sm:$0xff]   ;;  %v1940_v13 = vld [vmem:[#allocation5 + $0x64] ss:$8 sps:$4 sm:$0xff]  }
  0x93   : > { %v346_v14 = vld [vmem:[%s2552_s22 + $0x8] sm:$0xff]  ;;  %v349_v15 = vld [vmem:[%s2552_s22 + $0x20] sm:$0xff]  ;;  %v1943_v17 = vld [vmem:[#allocation5 + $0x74] ss:$8 sps:$4 sm:$0xff]   ;;  %s1560_s11 = sshll.u32 %s2548_s1, 7  ;;  %s1640_s23 = sshll.u32 %s2379_s28, 11 }
  0x94   : > { %720 = vmatpush1.bf16.msra.mxu0 %v1927_v4  ;;  %v1942_v16 = vld [vmem:[#allocation5 + $0x60] ss:$8 sps:$4 sm:$0xff]   ;;  %v394_v18 = vpack.c.bf16 %v349_v15, %v346_v14  ;;  %v2571_v20 = vld [vmem:[#allocation5 + $0x104] ss:$8 sps:$4 sm:$0xff]   ;;  %v2573_v21 = vld [vmem:[#allocation5 + $0x114] ss:$8 sps:$4 sm:$0xff]   ;;  %s2867_s8 = scalar_lea.hbm %s2923_s7, %s1640_s23 }
  0x95   : > { %721 = vmatprep.subr.bf16.mxu0 %v1928_v5  ;;  %v2569_v19 = vld [vmem:[#allocation5 + $0x100] ss:$8 sps:$4 sm:$0xff]   ;;  %1753 = vmatprep.subr.bf16.mxu1 %v2571_v20  ;;  %v2577_v22 = vld [vmem:[#allocation5 + $0x110] ss:$8 sps:$4 sm:$0xff]   ;;  %v2580_v24 = vld [vmem:[#allocation5 + $0x124] ss:$8 sps:$4 sm:$0xff]  }
  0x96   : > { %749 = vmatprep.mubr.bf16.mxu0 %v394_v18  ;;  %1761 = vmatpush1.bf16.msra.mxu1 %v2569_v19  ;;  %v1945_v23 = vld [vmem:[#allocation5 + $0x70] ss:$8 sps:$4 sm:$0xff]   ;;  %v1946_v25 = vld [vmem:[#allocation5 + $0x84] ss:$8 sps:$4 sm:$0xff]   ;;  %v2583_v26 = vld [vmem:[#allocation5 + $0x120] ss:$8 sps:$4 sm:$0xff]  }
  0x97   : > { %1754 = vmatprep.subr.bf16.mxu1 %v2573_v21  ;;  %v1948_v27 = vld [vmem:[#allocation5 + $0x80] ss:$8 sps:$4 sm:$0xff]   ;;  %v2586_v28 = vld [vmem:[#allocation5 + $0x134] ss:$8 sps:$4 sm:$0xff]   ;;  %v2589_v30 = vld [vmem:[#allocation5 + $0x130] ss:$8 sps:$4 sm:$0xff]  }
  0x98   : > { %722 = vmatpush1.bf16.msra.mxu0 %v1930_v6  ;;  %v1949_v29 = vld [vmem:[#allocation5 + $0x94] ss:$8 sps:$4 sm:$0xff]   ;;  %v1951_v31 = vld [vmem:[#allocation5 + $0x90] ss:$8 sps:$4 sm:$0xff]   ;;  %v2592_v32 = vld [vmem:[#allocation5 + $0x144] ss:$8 sps:$4 sm:$0xff]  }
  0x99   : > { %723 = vmatprep.subr.bf16.mxu0 %v1931_v7  ;;  %v1952_v33 = vld [vmem:[#allocation5 + $0xa4] ss:$8 sps:$4 sm:$0xff]   ;;  %v2595_v34 = vld [vmem:[#allocation5 + $0x140] ss:$8 sps:$4 sm:$0xff]   ;;  %v2598_v36 = vld [vmem:[#allocation5 + $0x154] ss:$8 sps:$4 sm:$0xff]  }
  0x9a   : > { %1762 = vmatpush1.bf16.msra.mxu1 %v2577_v22  ;;  %v1954_v35 = vld [vmem:[#allocation5 + $0xa0] ss:$8 sps:$4 sm:$0xff]   ;;  %v1955_v37 = vld [vmem:[#allocation5 + $0xb4] ss:$8 sps:$4 sm:$0xff]   ;;  %v2601_v38 = vld [vmem:[#allocation5 + $0x150] ss:$8 sps:$4 sm:$0xff]  }
  0x9b   : > { %1755 = vmatprep.subr.bf16.mxu1 %v2580_v24  ;;  %v1957_v39 = vld [vmem:[#allocation5 + $0xb0] ss:$8 sps:$4 sm:$0xff]   ;;  %v2604_v40 = vld [vmem:[#allocation5 + $0x164] ss:$8 sps:$4 sm:$0xff]   ;;  %v2607_v42 = vld [vmem:[#allocation5 + $0x160] ss:$8 sps:$4 sm:$0xff]  }
  0x9c   : > { %724 = vmatpush1.bf16.msra.mxu0 %v1933_v8  ;;  %v1958_v41 = vld [vmem:[#allocation5 + $0xc4] ss:$8 sps:$4 sm:$0xff]   ;;  %v1960_v43 = vld [vmem:[#allocation5 + $0xc0] ss:$8 sps:$4 sm:$0xff]   ;;  %v1961_v44 = vld [vmem:[#allocation5 + $0xd4] ss:$8 sps:$4 sm:$0xff]  }
  0x9d   : > { %725 = vmatprep.subr.bf16.mxu0 %v1934_v9  ;;  %v2610_v45 = vld [vmem:[#allocation5 + $0x174] ss:$8 sps:$4 sm:$0xff]   ;;  %v2612_v46 = vld [vmem:[#allocation5 + $0x170] ss:$8 sps:$4 sm:$0xff]   ;;  %v374_v48 = vld [vmem:[%s2552_s22 + $0xe8] sm:$0xff]  ;;  %s2847_s21 = scalar_lea.vmem [#allocation10], %s1560_s11 }
  0x9e   : > { %1763 = vmatpush1.bf16.msra.mxu1 %v2583_v26  ;;  %v1963_v49 = vld [vmem:[#allocation5 + $0xd0] ss:$8 sps:$4 sm:$0xff]   ;;  %v1964_v50 = vld [vmem:[#allocation5 + $0xe4] ss:$8 sps:$4 sm:$0xff]   ;;  %v1966_v51 = vld [vmem:[#allocation5 + $0xe0] ss:$8 sps:$4 sm:$0xff]   ;;  %v407_v52 = vpack.c.bf16 %v374_v48, %v371_v47 }
  0x9f   : > { %1756 = vmatprep.subr.bf16.mxu1 %v2586_v28  ;;  %v1967_v53 = vld [vmem:[#allocation5 + $0xf4] ss:$8 sps:$4 sm:$0xff]   ;;  %v377_v54 = vld [vmem:[%s2552_s22 + $0x100] sm:$0xff]  ;;  %v1969_v56 = vld [vmem:[#allocation5 + $0xf0] ss:$8 sps:$4 sm:$0xff]   ;;  %s1445_s17 = sshll.u32 %s2847_s21, 4  ;;  %s2869_s17 = int_to_ptr.vmem [resolvable:$true] %s1445_s17 }
  0xa0   : > { %726 = vmatpush1.bf16.msra.mxu0 %v1936_v10  ;;  %v380_v55 = vld [vmem:[%s2552_s22 + $0x118] sm:$0xff]  ;;  %v345_v57 = vld [vmem:[%s2552_s22] sm:$0xff]  ;;  %v355_v60 = vld [vmem:[%s2552_s22 + $0x50] sm:$0xff]  ;;  %s1432_s28 = scalar_lea.sflag [#allocation4], %s2548_s1  ;;  %s2228_s19 = scalar_lea.vmem %s2869_s17, 2048 }
  0xa1   : > { %727 = vmatprep.subr.bf16.mxu0 %v1937_v11  ;;  %v348_v58 = vld [vmem:[%s2552_s22 + $0x18] sm:$0xff]  ;;  %v410_v61 = vpack.c.bf16 %v380_v55, %v377_v54  ;;  %v383_v1 = vld [vmem:[%s2552_s22 + $0x130] sm:$0xff]  ;;  %v386_v2 = vld [vmem:[%s2552_s22 + $0x148] sm:$0xff]  ;;  %p2229_p10 = scmp.ne.s32.totalorder %s2869_s17, %s2228_s19 }
  0xa2   : > { %1764 = vmatpush1.bf16.msra.mxu1 %v2589_v30  ;;  %v352_v59 = vld [vmem:[%s2552_s22 + $0x38] sm:$0xff]  ;;  %v393_v62 = vpack.c.bf16 %v348_v58, %v345_v57  ;;  %v351_v3 = vld [vmem:[%s2552_s22 + $0x30] sm:$0xff]  ;;  %v354_v4 = vld [vmem:[%s2552_s22 + $0x48] sm:$0xff]  ;;  %v413_v7 = vpack.c.bf16 %v386_v2, %v383_v1 }
  0xa3   : > { %1757 = vmatprep.subr.bf16.mxu1 %v2592_v32  ;;  %v397_v63 = vpack.c.bf16 %v355_v60, %v352_v59  ;;  %v358_v5 = vld [vmem:[%s2552_s22 + $0x68] sm:$0xff]  ;;  %v361_v6 = vld [vmem:[%s2552_s22 + $0x80] sm:$0xff]  ;;  %v396_v8 = vpack.c.bf16 %v354_v4, %v351_v3  ;;  %v392_v11 = vld [vmem:[%s2552_s22 + $0x178] sm:$0xff]  ;;  %p2230_p3 = pnand %p2229_p10, %p2500_p5 }
  0xa4   : > { %728 = vmatpush1.bf16.msra.mxu0 %v1939_v12  ;;  %v400_v9 = vpack.c.bf16 %v361_v6, %v358_v5  ;;  %v389_v10 = vld [vmem:[%s2552_s22 + $0x160] sm:$0xff]  ;;  %v364_v14 = vld [vmem:[%s2552_s22 + $0x98] sm:$0xff]  ;;  %v367_v15 = vld [vmem:[%s2552_s22 + $0xb0] sm:$0xff] }
  0xa5   : > { %729 = vmatprep.subr.bf16.mxu0 %v1940_v13  ;;  %v357_v12 = vld [vmem:[%s2552_s22 + $0x60] sm:$0xff]  ;;  %v360_v13 = vld [vmem:[%s2552_s22 + $0x78] sm:$0xff]  ;;  %v403_v18 = vpack.c.bf16 %v367_v15, %v364_v14  ;;  %v350_v47 = vld [vmem:[%s2552_s22 + $0x28] sm:$0xff]  ;;  %p2231_p7 = pneg %p2230_p3 }
  0xa6   : > { %1765 = vmatpush1.bf16.msra.mxu1 %v2595_v34  ;;  %v365_v55 = vld [vmem:[%s2552_s22 + $0xa0] sm:$0xff]  ;;  %v1996_v60 = vld [vmem:[#allocation7 + $0x48] sm:$0xff]   ;;  %v2000_v1 = vld [vmem:[#allocation7 + $0x58] sm:$0xff]  }
  0xa7   : > { %1758 = vmatprep.subr.bf16.mxu1 %v2598_v36  ;;  %v1994_v58 = vld [vmem:[#allocation7 + $0x40] sm:$0xff]   ;;  %v2001_v2 = vld [vmem:[#allocation7 + $0x18] sm:$0xff]   ;;  %v2004_v4 = vld [vmem:[#allocation7 + $0x68] sm:$0xff]  }
  0xa8   : > { %730 = vmatpush1.bf16.msra.mxu0 %v1942_v16  ;;  %v416_v16 = vpack.c.bf16 %v392_v11, %v389_v10  ;;  %v1995_v59 = vld [vmem:[#allocation7] sm:$0xff]   ;;  %v2005_v5 = vld [vmem:[#allocation7 + $0x28] sm:$0xff]   ;;  %v2006_v6 = vld [vmem:[#allocation7 + $0x70] sm:$0xff]  }
  0xa9   : > { %731 = vmatprep.subr.bf16.mxu0 %v1943_v17  ;;  %v399_v17 = vpack.c.bf16 %v360_v13, %v357_v12  ;;  %v2003_v3 = vld [vmem:[#allocation7 + $0x20] sm:$0xff]  }
  0xaa   : > { %1766 = vmatpush1.bf16.msra.mxu1 %v2601_v38 }
  0xab   : > { %1759 = vmatprep.subr.bf16.mxu1 %v2604_v40 }
  0xac   : > { %732 = vmatpush1.bf16.msra.mxu0 %v1945_v23 }
  0xad   : > { %733 = vmatprep.subr.bf16.mxu0 %v1946_v25  ;;  %v369_v25 = vld [vmem:[%s2552_s22 + $0xc0] sm:$0xff] }
  0xae   : > { %1767 = vmatpush1.bf16.msra.mxu1 %v2607_v42 }
  0xaf   : > { %1760 = vmatprep.subr.bf16.mxu1 %v2610_v45 }
  0xb0   : > { %734 = vmatpush1.bf16.msra.mxu0 %v1948_v27  ;;  %v376_v27 = vld [vmem:[%s2552_s22 + $0xf8] sm:$0xff] }
  0xb1   : > { %735 = vmatprep.subr.bf16.mxu0 %v1949_v29 }
  0xb2   : > { %1768 = vmatpush1.bf16.msra.mxu1 %v2612_v46 }
  0xb3   : > { %1641 = vmatprep.subr.bf16.mxu1 %v1994_v58 }
  0xb4   : > { %736 = vmatpush1.bf16.msra.mxu0 %v1951_v31  ;;  %v375_v31 = vld [vmem:[%s2552_s22 + $0xf0] sm:$0xff] }
  0xb5   : > { %737 = vmatprep.subr.bf16.mxu0 %v1952_v33  ;;  %903 = vmatmul.mubr.bf16.vlgmr.msra.gmra.mrb[0].mxu1 %v407_v52  ;;  %v382_v33 = vld [vmem:[%s2552_s22 + $0x128] sm:$0xff]  ;;  %v359_v52 = vld [vmem:[%s2552_s22 + $0x70] sm:$0xff] }
  0xb6   : > { %912 = vmatprep.mubr.bf16.mxu1 %v2314_v0  ;;  %1642 = vmatpush3.bf16.msra.mxu1 %v1995_v59 }
  0xb7   : > { %1643 = vmatprep.subr.bf16.mxu1 %v1996_v60 }
  0xb8   : > { %738 = vmatpush1.bf16.msra.mxu0 %v1954_v35 }
  0xb9   : > { %739 = vmatprep.subr.bf16.mxu0 %v1955_v37  ;;  %v381_v37 = vld [vmem:[%s2552_s22 + $0x120] sm:$0xff] }
  0xbc   : > { %740 = vmatpush1.bf16.msra.mxu0 %v1957_v39  ;;  %v388_v39 = vld [vmem:[%s2552_s22 + $0x158] sm:$0xff] }
  0xbd   : > { %741 = vmatprep.subr.bf16.mxu0 %v1958_v41  ;;  %913 = vmatmul.mubr.bf16.gmra.mrb[4].mxu1 %v410_v61  ;;  %v1997_v61 = vld [vmem:[#allocation7 + $0x8] sm:$0xff]  }
  0xbe   : > { %922 = vmatprep.mubr.bf16.mxu1 %v2314_v0  ;;  %1644 = vmatpush3.bf16.msra.mxu1 %v1997_v61 }
  0xc0   : > { %742 = vmatpush1.bf16.msra.mxu0 %v1960_v43  ;;  %v387_v43 = vld [vmem:[%s2552_s22 + $0x150] sm:$0xff] }
  0xc1   : > { %743 = vmatprep.subr.bf16.mxu0 %v1961_v44  ;;  %v390_v44 = vld [vmem:[%s2552_s22 + $0x168] sm:$0xff] }
  0xc4   : > { %744 = vmatpush1.bf16.msra.mxu0 %v1963_v49  ;;  %v353_v49 = vld [vmem:[%s2552_s22 + $0x40] sm:$0xff] }
  0xc5   : > { %745 = vmatprep.subr.bf16.mxu0 %v1964_v50  ;;  %923 = vmatmul.mubr.bf16.gmra.mrb[8].mxu1 %v413_v7  ;;  %v356_v50 = vld [vmem:[%s2552_s22 + $0x58] sm:$0xff]  ;;  %v2007_v7 = vld [vmem:[#allocation7 + $0x30] sm:$0xff]  }
  0xc6   : > { %932 = vmatprep.mubr.bf16.mxu1 %v2314_v0 }
  0xc8   : > { %746 = vmatpush1.bf16.msra.mxu0 %v1966_v51  ;;  %v398_v51 = vpack.c.bf16 %v356_v50, %v353_v49 }
  0xc9   : > { %747 = vmatprep.subr.bf16.mxu0 %v1967_v53  ;;  %v362_v53 = vld [vmem:[%s2552_s22 + $0x88] sm:$0xff] }
  0xca   : > { %v401_v54 = vpack.c.bf16 %v362_v53, %v359_v52 }
  0xcc   : > { %748 = vmatpush1.bf16.msra.mxu0 %v1969_v56  ;;  %v368_v56 = vld [vmem:[%s2552_s22 + $0xb8] sm:$0xff] }
  0xcd   : > { %830 = vmatprep.subr.bf16.mxu0 %v2571_v20  ;;  %933 = vmatmul.mubr.bf16.gmra.mrb[12].mxu1 %v416_v16  ;;  %v366_v20 = vld [vmem:[%s2552_s22 + $0xa8] sm:$0xff]  ;;  %v404_v57 = vpack.c.bf16 %v368_v56, %v365_v55 }
  0xcf   : > { %750 = vmatmul.mubr.bf16.vlgmr.msra.gmra.mrb[0].mxu0 %v393_v62  ;;  %v1998_v62 = vld [vmem:[#allocation7 + $0x50] sm:$0xff]  }
  0xd0   : > { %831 = vmatpush1.bf16.msra.mxu0 %v2569_v19  ;;  %759 = vmatprep.mubr.bf16.mxu0 %v397_v63  ;;  %v363_v19 = vld [vmem:[%s2552_s22 + $0x90] sm:$0xff] }
  0xd1   : > { %832 = vmatprep.subr.bf16.mxu0 %v2573_v21  ;;  %v370_v21 = vld [vmem:[%s2552_s22 + $0xc8] sm:$0xff]  ;;  %v402_v23 = vpack.c.bf16 %v366_v20, %v363_v19  ;;  %v1999_v63 = vld [vmem:[#allocation7 + $0x10] sm:$0xff]   ;;  %1645 = vmatprep.subr.bf16.mxu1 %v1998_v62 }
  0xd2   : > { %1646 = vmatpush3.bf16.msra.mxu1 %v1999_v63 }
  0xd3   : > { %1647 = vmatprep.subr.bf16.mxu1 %v2000_v1 }
  0xd4   : > { %833 = vmatpush1.bf16.msra.mxu0 %v2577_v22  ;;  %v373_v22 = vld [vmem:[%s2552_s22 + $0xe0] sm:$0xff] }
  0xd5   : > { %834 = vmatprep.subr.bf16.mxu0 %v2580_v24  ;;  %v406_v24 = vpack.c.bf16 %v373_v22, %v370_v21  ;;  %v2692_v22 = vld [vmem:[#allocation8] sm:$0xff]  }
  0xd6   : > { %1648 = vmatpush3.bf16.msra.mxu1 %v2001_v2 }
  0xd7   : > { %760 = vmatmul.mubr.bf16.gmra.mrb[4].mxu0 %v396_v8  ;;  %v2008_v8 = vld [vmem:[#allocation7 + $0x78] sm:$0xff]  }
  0xd8   : > { %769 = vmatprep.mubr.bf16.mxu0 %v400_v9  ;;  %835 = vmatpush1.bf16.msra.mxu0 %v2583_v26  ;;  %v372_v26 = vld [vmem:[%s2552_s22 + $0xd8] sm:$0xff] }
  0xd9   : > { %836 = vmatprep.subr.bf16.mxu0 %v2586_v28  ;;  %v379_v28 = vld [vmem:[%s2552_s22 + $0x110] sm:$0xff]  ;;  %v405_v29 = vpack.c.bf16 %v372_v26, %v369_v25  ;;  %v2009_v9 = vld [vmem:[#allocation7 + $0x38] sm:$0xff]   ;;  %v467_v25 = vlaneseq }
  0xdc   : > { %837 = vmatpush1.bf16.msra.mxu0 %v2589_v30  ;;  %v409_v30 = vpack.c.bf16 %v379_v28, %v376_v27  ;;  %v468_v28 = vshrl.u32 %v467_v25, 7 }
  0xdd   : > { %838 = vmatprep.subr.bf16.mxu0 %v2592_v32  ;;  %v378_v32 = vld [vmem:[%s2552_s22 + $0x108] sm:$0xff] }
  0xde   : > { %v408_v35 = vpack.c.bf16 %v378_v32, %v375_v31  ;;  %v473_v31 = vsub.s32 1, %v468_v28 }
  0xdf   : > { %770 = vmatmul.mubr.bf16.gmra.mrb[8].mxu0 %v399_v17 }
  0xe0   : > { %779 = vmatprep.mubr.bf16.mxu0 %v403_v18  ;;  %839 = vmatpush1.bf16.msra.mxu0 %v2595_v34  ;;  %v385_v34 = vld [vmem:[%s2552_s22 + $0x140] sm:$0xff] }
  0xe1   : > { %840 = vmatprep.subr.bf16.mxu0 %v2598_v36  ;;  %v412_v36 = vpack.c.bf16 %v385_v34, %v382_v33 }
  0xe4   : > { %841 = vmatpush1.bf16.msra.mxu0 %v2601_v38  ;;  %v384_v38 = vld [vmem:[%s2552_s22 + $0x138] sm:$0xff] }
  0xe5   : > { %842 = vmatprep.subr.bf16.mxu0 %v2604_v40  ;;  %v391_v40 = vld [vmem:[%s2552_s22 + $0x170] sm:$0xff]  ;;  %v411_v41 = vpack.c.bf16 %v384_v38, %v381_v37 }
  0xe7   : > { %780 = vmatmul.mubr.bf16.gmra.mrb[12].mxu0 %v402_v23 }
  0xe8   : > { %789 = vmatprep.mubr.bf16.mxu0 %v406_v24  ;;  %843 = vmatpush1.bf16.msra.mxu0 %v2607_v42  ;;  %v415_v42 = vpack.c.bf16 %v391_v40, %v388_v39 }
  0xe9   : > { %844 = vmatprep.subr.bf16.mxu0 %v2610_v45  ;;  %v414_v45 = vpack.c.bf16 %v390_v44, %v387_v43 }
  0xec   : > { %845 = vmatpush1.bf16.msra.mxu0 %v2612_v46  ;;  %v347_v46 = vld [vmem:[%s2552_s22 + $0x10] sm:$0xff]  ;;  %s2315_s22 = smov [#allocation10]  }
  0xed   : > { %v395_v48 = vpack.c.bf16 %v350_v47, %v347_v46  ;;  %s2232_s30 = sshll.u32 %s2315_s22, 4  ;;  %s2233_s30 = int_to_ptr.vmem [resolvable:$false] %s2232_s30 }
  0xee   : > { %s2234_s9 = scalar_lea.vmem %s2233_s30, 4096  ;;  %p2235_p12 = scmp.lt.s32.totalorder %s2869_s17, %s2233_s30 }
  0xef   : > { %790 = vmatmul.mubr.bf16.gmra.mrb[16].mxu0 %v405_v29  ;;  %v469_v29 = vsub.s32 0, %v468_v28  ;;  %p2236_p2 = scmp.lt.s32.totalorder %s2234_s9, %s2228_s19 }
  0xf0   : > { %799 = vmatprep.mubr.bf16.mxu0 %v409_v30  ;;  %v465_v30 = vld [vmem:[%s2918_s2] sm:$0x3] }
  0xf1   : > { %v2706_v32 = vrot.slane %v465_v30, %v469_v29  ;;  %v2708_v33 = vrot.slane %v465_v30, %v473_v31  ;;  %p2237_p1 = por %p2236_p2, %p2235_p12 }
  0xf3   : > { %p2238_p4 = pnand %p2237_p1, %p2231_p7 }
  0xf7   : > { %800 = vmatmul.mubr.bf16.gmra.mrb[20].mxu0 %v408_v35 }
  0xf8   : > { %809 = vmatprep.mubr.bf16.mxu0 %v412_v36 }
  0xff   : > { %810 = vmatmul.mubr.bf16.gmra.mrb[24].mxu0 %v411_v41 }
 0x100   : > { %819 = vmatprep.mubr.bf16.mxu0 %v415_v42 }
 0x107   : > { %820 = vmatmul.mubr.bf16.gmra.mrb[28].mxu0 %v414_v45 }
 0x108   : > { %862 = vmatprep.mubr.bf16.mxu0 %v2314_v0 }
 0x10f   : > { %863 = vmatmul.mubr.bf16.vlgmr.msra.gmra.mrb[0].mxu0 %v395_v48 }
 0x110   : > { %872 = vmatprep.mubr.bf16.mxu0 %v2314_v0 }
 0x117   : > { %873 = vmatmul.mubr.bf16.gmra.mrb[4].mxu0 %v398_v51 }
 0x118   : > { %882 = vmatprep.mubr.bf16.mxu0 %v2314_v0 }
 0x11f   : > { %883 = vmatmul.mubr.bf16.gmra.mrb[8].mxu0 %v401_v54 }
 0x120   : > { %892 = vmatprep.mubr.bf16.mxu0 %v2314_v0  ;;  %v2002_v0 = vld [vmem:[#allocation7 + $0x60] sm:$0xff]  }
 0x121   : > { %1649 = vmatprep.subr.bf16.mxu1 %v2002_v0 }
 0x122   : > { %1650 = vmatpush3.bf16.msra.mxu1 %v2003_v3 }
 0x123   : > { %1651 = vmatprep.subr.bf16.mxu1 %v2004_v4 }
 0x126   : > { %1652 = vmatpush3.bf16.msra.mxu1 %v2005_v5 }
 0x127   : > { %893 = vmatmul.mubr.bf16.gmra.mrb[12].mxu0 %v404_v57  ;;  %1653 = vmatprep.subr.bf16.mxu1 %v2006_v6 }
 0x12a   : > { %1654 = vmatpush3.bf16.msra.mxu1 %v2007_v7 }
 0x12b   : > { %1655 = vmatprep.subr.bf16.mxu1 %v2008_v8 }
 0x12e   : > { %1656 = vmatpush3.bf16.msra.mxu1 %v2009_v9 }
 0x12f   : > { %1721 = vmatprep.subr.bf16.mxu1 %v2692_v22 }
 0x188   : > { %v904_v10 = vpop.f32.mrb[0].mxu1 }
 0x189   : > { %v906_v11 = vpop.f32.mrb[1].mxu1 }
 0x18a   : > { %v908_v12 = vpop.f32.mrb[2].mxu1 }
 0x18b   : > { %v910_v13 = vpop.f32.mrb[3].mxu1 }
 0x190   : > { %v914_v14 = vpop.f32.mrb[4].mxu1 }
 0x191   : > { %v916_v15 = vpop.f32.mrb[5].mxu1 }
 0x192   : > { %v918_v16 = vpop.f32.mrb[6].mxu1 }
 0x193   : > { %v920_v17 = vpop.f32.mrb[7].mxu1 }
 0x198   : > { %v924_v18 = vpop.f32.mrb[8].mxu1 }
 0x199   : > { %v2686_v19 = vpop.f32.mrb[9].mxu1 }
 0x19a   : > { %v2688_v20 = vpop.f32.mrb[10].mxu1 }
 0x19b   : > { %v2690_v21 = vpop.f32.mrb[11].mxu1 }
 0x1a0   : > { %v2695_v23 = vpop.f32.mrb[12].mxu1 }
 0x1a1   : > { %v2697_v24 = vpop.f32.mrb[13].mxu1 }
 0x1a2   : > { %v2699_v26 = vpop.f32.mrb[14].mxu1 }
 0x1a3   : > { %v2701_v27 = vpop.f32.mrb[15].mxu1 }
 0x1c2   : > { %v791_v34 = vpop.f32.mrb[16].mxu0 }
 0x1c3   : > { %v792_v35 = vadd.f32 %v791_v34, %v2706_v32  ;;  %v793_v36 = vpop.f32.mrb[17].mxu0 }
 0x1c4   : > { %v794_v37 = vadd.f32 %v793_v36, %v2708_v33  ;;  %v795_v38 = vpop.f32.mrb[18].mxu0 }
 0x1c5   : > { %v796_v39 = vadd.f32 %v795_v38, %v2706_v32  ;;  %v905_v40 = vadd.f32 %v904_v10, %v792_v35  ;;  %v797_v41 = vpop.f32.mrb[19].mxu0 }
 0x1c6   : > { %v798_v42 = vadd.f32 %v797_v41, %v2708_v33  ;;  %v907_v43 = vadd.f32 %v906_v11, %v794_v37 }
 0x1c7   : > { %2018 = vtanh.f32 %v905_v40  ;;  %v909_v44 = vadd.f32 %v908_v12, %v796_v39 }
 0x1c8   : > { %2020 = vtanh.f32 %v907_v43  ;;  %v911_v45 = vadd.f32 %v910_v13, %v798_v42 }
 0x1c9   : > { %2022 = vtanh.f32 %v909_v44 }
 0x1ca   : > { %2024 = vtanh.f32 %v911_v45  ;;  %v801_v46 = vpop.f32.mrb[20].mxu0 }
 0x1cb   : > { %v802_v47 = vadd.f32 %v801_v46, %v2706_v32  ;;  %v803_v48 = vpop.f32.mrb[21].mxu0 }
 0x1cc   : > { %v804_v49 = vadd.f32 %v803_v48, %v2708_v33  ;;  %v805_v50 = vpop.f32.mrb[22].mxu0 }
 0x1cd   : > { %v806_v51 = vadd.f32 %v805_v50, %v2706_v32  ;;  %v915_v52 = vadd.f32 %v914_v14, %v802_v47  ;;  %v807_v53 = vpop.f32.mrb[23].mxu0 }
 0x1ce   : > { %v808_v54 = vadd.f32 %v807_v53, %v2708_v33  ;;  %v917_v55 = vadd.f32 %v916_v15, %v804_v49 }
 0x1cf   : > { %2026 = vtanh.f32 %v915_v52  ;;  %v919_v56 = vadd.f32 %v918_v16, %v806_v51 }
 0x1d0   : > { %2028 = vtanh.f32 %v917_v55  ;;  %v921_v57 = vadd.f32 %v920_v17, %v808_v54 }
 0x1d1   : > { %v2718_v58 = vpop.eup %2018  ;;  %2030 = vtanh.f32 %v919_v56 }
 0x1d2   : > { %v2720_v59 = vpop.eup %2020  ;;  %2032 = vtanh.f32 %v921_v57  ;;  %v811_v60 = vpop.f32.mrb[24].mxu0 }
 0x1d3   : > { %v2722_v61 = vpop.eup %2022  ;;  %v812_v62 = vadd.f32 %v811_v60, %v2706_v32  ;;  %v813_v63 = vpop.f32.mrb[25].mxu0 }
 0x1d4   : > { %v2725_v1 = vpop.eup %2024  ;;  %v814_v2 = vadd.f32 %v813_v63, %v2708_v33  ;;  %v815_v0 = vpop.f32.mrb[26].mxu0  ;;  %v983_v3 = vpack.c.bf16 %v2722_v61, %v2718_v58  ;;  %v2013_v58 = vld [vmem:[#allocation8 + $0x18] sm:$0xff]   ;;  %v2015_v61 = vld [vmem:[#allocation8 + $0x28] sm:$0xff]  }
 0x1d5   : > { %v816_v4 = vadd.f32 %v815_v0, %v2706_v32  ;;  %v925_v5 = vadd.f32 %v924_v18, %v812_v62  ;;  %v817_v6 = vpop.f32.mrb[27].mxu0  ;;  %v984_v7 = vpack.c.bf16 %v2725_v1, %v2720_v59  ;;  %v2014_v59 = vld [vmem:[#allocation8 + $0x20] sm:$0xff]   ;;  %v2016_v1 = vld [vmem:[#allocation8 + $0x30] sm:$0xff]  }
 0x1d6   : > { %v818_v8 = vadd.f32 %v817_v6, %v2708_v33  ;;  %v927_v9 = vadd.f32 %v2686_v19, %v814_v2 }
 0x1d7   : > { %2034 = vtanh.f32 %v925_v5  ;;  %v929_v10 = vadd.f32 %v2688_v20, %v816_v4 }
 0x1d8   : > { %2036 = vtanh.f32 %v927_v9  ;;  %v931_v11 = vadd.f32 %v2690_v21, %v818_v8 }
 0x1d9   : > { %v2737_v12 = vpop.eup %2026  ;;  %2038 = vtanh.f32 %v929_v10 }
 0x1da   : > { %v2739_v13 = vpop.eup %2028  ;;  %2040 = vtanh.f32 %v931_v11  ;;  %v821_v14 = vpop.f32.mrb[28].mxu0 }
 0x1db   : > { %v2741_v15 = vpop.eup %2030  ;;  %v822_v16 = vadd.f32 %v821_v14, %v2706_v32  ;;  %v823_v17 = vpop.f32.mrb[29].mxu0 }
 0x1dc   : > { %v2744_v18 = vpop.eup %2032  ;;  %v824_v19 = vadd.f32 %v823_v17, %v2708_v33  ;;  %v825_v20 = vpop.f32.mrb[30].mxu0  ;;  %v985_v21 = vpack.c.bf16 %v2741_v15, %v2737_v12  ;;  %v2011_v17 = vld [vmem:[#allocation8 + $0x8] sm:$0xff]   ;;  %v2825_v12 = vld [vmem:[%s2920_s4] ss:$0 sm:$0xff] }
 0x1dd   : > { %v826_v25 = vadd.f32 %v825_v20, %v2706_v32  ;;  %v935_v28 = vadd.f32 %v2695_v23, %v822_v16  ;;  %v827_v29 = vpop.f32.mrb[31].mxu0  ;;  %v986_v30 = vpack.c.bf16 %v2744_v18, %v2739_v13 }
 0x1de   : > { %v828_v31 = vadd.f32 %v827_v29, %v2708_v33  ;;  %v937_v34 = vadd.f32 %v2697_v24, %v824_v19 }
 0x1df   : > { %2042 = vtanh.f32 %v935_v28  ;;  %v939_v35 = vadd.f32 %v2699_v26, %v826_v25 }
 0x1e0   : > { %2044 = vtanh.f32 %v937_v34  ;;  %v941_v36 = vadd.f32 %v2701_v27, %v828_v31 }
 0x1e1   : > { %v2757_v37 = vpop.eup %2034  ;;  %2046 = vtanh.f32 %v939_v35 }
 0x1e2   : > { %v2759_v38 = vpop.eup %2036  ;;  %2048 = vtanh.f32 %v941_v36  ;;  %v864_v23 = vpop.f32.mrb[0].mxu0 }
 0x1e3   : > { %v2761_v39 = vpop.eup %2038  ;;  %v1769_v40 = vadd.f32 %v864_v23, %v2706_v32  ;;  %v866_v41 = vpop.f32.mrb[1].mxu0 }
 0x1e4   : > { %v2764_v42 = vpop.eup %2040  ;;  %v1770_v24 = vadd.f32 %v866_v41, %v2708_v33  ;;  %v868_v26 = vpop.f32.mrb[2].mxu0  ;;  %v987_v27 = vpack.c.bf16 %v2761_v39, %v2757_v37 }
 0x1e5   : > { %2050 = vtanh.f32 %v1769_v40  ;;  %v1771_v43 = vadd.f32 %v868_v26, %v2706_v32  ;;  %v870_v44 = vpop.f32.mrb[3].mxu0  ;;  %v988_v45 = vpack.c.bf16 %v2764_v42, %v2759_v38 }
 0x1e6   : > { %2052 = vtanh.f32 %v1770_v24  ;;  %v1772_v46 = vadd.f32 %v870_v44, %v2708_v33 }
 0x1e7   : > { %2054 = vtanh.f32 %v1771_v43 }
 0x1e8   : > { %2056 = vtanh.f32 %v1772_v46 }
 0x1e9   : > { %v2773_v47 = vpop.eup %2042 }
 0x1ea   : > { %v2775_v48 = vpop.eup %2044  ;;  %v874_v49 = vpop.f32.mrb[4].mxu0 }
 0x1eb   : > { %v2777_v50 = vpop.eup %2046  ;;  %v1773_v51 = vadd.f32 %v874_v49, %v2706_v32  ;;  %v876_v52 = vpop.f32.mrb[5].mxu0 }
 0x1ec   : > { %v2780_v53 = vpop.eup %2048  ;;  %v1774_v54 = vadd.f32 %v876_v52, %v2708_v33  ;;  %v878_v55 = vpop.f32.mrb[6].mxu0  ;;  %v989_v56 = vpack.c.bf16 %v2777_v50, %v2773_v47 }
 0x1ed   : > { %2058 = vtanh.f32 %v1773_v51  ;;  %v1775_v57 = vadd.f32 %v878_v55, %v2706_v32  ;;  %v880_v60 = vpop.f32.mrb[7].mxu0  ;;  %v990_v62 = vpack.c.bf16 %v2780_v53, %v2775_v48 }
 0x1ee   : > { %2060 = vtanh.f32 %v1774_v54  ;;  %v1776_v63 = vadd.f32 %v880_v60, %v2708_v33 }
 0x1ef   : > { %v2051_v2 = vpop.eup %2050  ;;  %2062 = vtanh.f32 %v1775_v57 }
 0x1f0   : > { %v2053_v0 = vpop.eup %2052  ;;  %2064 = vtanh.f32 %v1776_v63 }
 0x1f1   : > { %v2055_v4 = vpop.eup %2054 }
 0x1f2   : > { %v2057_v5 = vpop.eup %2056  ;;  %v884_v6 = vpop.f32.mrb[8].mxu0  ;;  %v975_v8 = vpack.c.bf16 %v2055_v4, %v2051_v2 }
 0x1f3   : > { %v1777_v9 = vadd.f32 %v884_v6, %v2706_v32  ;;  %v886_v10 = vpop.f32.mrb[9].mxu0  ;;  %v976_v11 = vpack.c.bf16 %v2057_v5, %v2053_v0 }
 0x1f4   : > { %v1778_v14 = vadd.f32 %v886_v10, %v2708_v33  ;;  %v888_v16 = vpop.f32.mrb[10].mxu0 }
 0x1f5   : > { %2066 = vtanh.f32 %v1777_v9  ;;  %v1779_v19 = vadd.f32 %v888_v16, %v2706_v32  ;;  %v890_v20 = vpop.f32.mrb[11].mxu0  ;;  %1158 = vmatprep.mubr.bf16.mxu1 %v976_v11 }
 0x1f6   : > { %2068 = vtanh.f32 %v1778_v14  ;;  %v1780_v25 = vadd.f32 %v890_v20, %v2708_v33  ;;  %1159 = vmatmul.mubr.bf16.vlgmr.msra.gmra.mrb[16].mxu1 %v975_v8 }
 0x1f7   : > { %v2059_v28 = vpop.eup %2058  ;;  %2070 = vtanh.f32 %v1779_v19  ;;  %1722 = vmatpush3.bf16.msra.mxu1 %v2692_v22 }
 0x1f8   : > { %v2061_v29 = vpop.eup %2060  ;;  %2072 = vtanh.f32 %v1780_v25  ;;  %1723 = vmatprep.subr.bf16.mxu1 %v2011_v17 }
 0x1f9   : > { %v2063_v31 = vpop.eup %2062 }
 0x1fa   : > { %v2065_v34 = vpop.eup %2064  ;;  %v894_v35 = vpop.f32.mrb[12].mxu0  ;;  %v977_v36 = vpack.c.bf16 %v2063_v31, %v2059_v28 }
 0x1fb   : > { %v1781_v23 = vadd.f32 %v894_v35, %v2706_v32  ;;  %v896_v40 = vpop.f32.mrb[13].mxu0  ;;  %v978_v41 = vpack.c.bf16 %v2065_v34, %v2061_v29  ;;  %1724 = vmatpush3.bf16.msra.mxu1 %v2011_v17 }
 0x1fc   : > { %v1782_v24 = vadd.f32 %v896_v40, %v2708_v33  ;;  %v898_v26 = vpop.f32.mrb[14].mxu0 }
 0x1fd   : > { %2074 = vtanh.f32 %v1781_v23  ;;  %v1783_v43 = vadd.f32 %v898_v26, %v2706_v32  ;;  %v900_v44 = vpop.f32.mrb[15].mxu0  ;;  %1166 = vmatprep.mubr.bf16.mxu1 %v978_v41 }
 0x1fe   : > { %2076 = vtanh.f32 %v1782_v24  ;;  %v1784_v22 = vadd.f32 %v900_v44, %v2708_v33  ;;  %1167 = vmatmul.mubr.bf16.gmra.mrb[20].mxu1 %v977_v36  ;;  %v2012_v33 = vld [vmem:[#allocation8 + $0x10] sm:$0xff]  }
 0x1ff   : > { %v2067_v46 = vpop.eup %2066  ;;  %2078 = vtanh.f32 %v1783_v43  ;;  %1725 = vmatprep.subr.bf16.mxu1 %v2012_v33 }
 0x200   : > { %v2069_v49 = vpop.eup %2068  ;;  %2080 = vtanh.f32 %v1784_v22  ;;  %1726 = vmatpush3.bf16.msra.mxu1 %v2012_v33 }
 0x201   : > { %v2071_v51 = vpop.eup %2070  ;;  %1727 = vmatprep.subr.bf16.mxu1 %v2013_v58 }
 0x202   : > { %v2073_v52 = vpop.eup %2072  ;;  %v979_v54 = vpack.c.bf16 %v2071_v51, %v2067_v46 }
 0x203   : > { %v980_v55 = vpack.c.bf16 %v2073_v52, %v2069_v49 }
 0x204   : > { %1728 = vmatpush3.bf16.msra.mxu1 %v2013_v58 }
 0x205   : > { %1174 = vmatprep.mubr.bf16.mxu1 %v980_v55  ;;  %1729 = vmatprep.subr.bf16.mxu1 %v2014_v59 }
 0x206   : > { %1175 = vmatmul.mubr.bf16.gmra.mrb[24].mxu1 %v979_v54 }
 0x207   : > { %v2075_v57 = vpop.eup %2074 }
 0x208   : > { %v2077_v60 = vpop.eup %2076  ;;  %1730 = vmatpush3.bf16.msra.mxu1 %v2014_v59 }
 0x209   : > { %v2079_v63 = vpop.eup %2078  ;;  %1731 = vmatprep.subr.bf16.mxu1 %v2015_v61 }
 0x20a   : > { %v2081_v32 = vpop.eup %2080  ;;  %v981_v2 = vpack.c.bf16 %v2079_v63, %v2075_v57 }
 0x20b   : > { %v982_v0 = vpack.c.bf16 %v2081_v32, %v2077_v60 }
 0x20c   : > { %1732 = vmatpush3.bf16.msra.mxu1 %v2015_v61 }
 0x20d   : > { %1182 = vmatprep.mubr.bf16.mxu1 %v982_v0  ;;  %1733 = vmatprep.subr.bf16.mxu1 %v2016_v1 }
 0x20e   : > { %1183 = vmatmul.mubr.bf16.gmra.mrb[28].mxu1 %v981_v2 }
 0x20f   : > { %1190 = vmatprep.mubr.bf16.mxu1 %v984_v7 }
 0x210   : > { %1734 = vmatpush3.bf16.msra.mxu1 %v2016_v1 }
 0x216   : > { %1191 = vmatmul.mubr.bf16.gmra.mrb[32].mxu1 %v983_v3  ;;  %v2017_v3 = vld [vmem:[#allocation8 + $0x38] sm:$0xff]  }
 0x217   : > { %1198 = vmatprep.mubr.bf16.mxu1 %v986_v30  ;;  %1735 = vmatprep.subr.bf16.mxu1 %v2017_v3 }
 0x218   : > { %1736 = vmatpush3.bf16.msra.mxu1 %v2017_v3 }
 0x21e   : > { %1199 = vmatmul.mubr.bf16.gmra.mrb[36].mxu1 %v985_v21 }
 0x21f   : > { %1206 = vmatprep.mubr.bf16.mxu1 %v988_v45 }
 0x226   : > { %1207 = vmatmul.mubr.bf16.gmra.mrb[40].mxu1 %v987_v27 }
 0x227   : > { %1214 = vmatprep.mubr.bf16.mxu1 %v990_v62 }
 0x22e   : > { %1215 = vmatmul.mubr.bf16.gmra.mrb[44].mxu1 %v989_v56 }
 0x2c9   : > { %v1657_v7 = vpop.f32.mrb[16].mxu1 }
 0x2ca   : > { %v1658_v13 = vpop.f32.mrb[17].mxu1 }
 0x2cb   : > { %v1659_v15 = vadd.f32 %v1658_v13, %v1657_v7  ;;  %v1660_v18 = vpop.f32.mrb[18].mxu1 }
 0x2cc   : > { %v1661_v21 = vpop.f32.mrb[19].mxu1 }
 0x2cd   : > { %v1161_v30 = vadd.f32 %v1659_v15, %v2825_v12  ;;  %v1662_v37 = vadd.f32 %v1661_v21, %v1660_v18 }
 0x2cf   : > { %v1164_v38 = vadd.f32 %v1662_v37, %v2825_v12  ;;  %2082 = vtanh.f32 %v1161_v30 }
 0x2d1   : > { %2084 = vtanh.f32 %v1164_v38  ;;  %v1663_v39 = vpop.f32.mrb[20].mxu1 }
 0x2d2   : > { %v1664_v42 = vpop.f32.mrb[21].mxu1 }
 0x2d3   : > { %v1665_v27 = vadd.f32 %v1664_v42, %v1663_v39  ;;  %v1666_v45 = vpop.f32.mrb[22].mxu1 }
 0x2d4   : > { %v1667_v47 = vpop.f32.mrb[23].mxu1 }
 0x2d5   : > { %v1169_v48 = vadd.f32 %v1665_v27, %v2825_v12  ;;  %v1668_v50 = vadd.f32 %v1667_v47, %v1666_v45 }
 0x2d7   : > { %v1172_v53 = vadd.f32 %v1668_v50, %v2825_v12  ;;  %2086 = vtanh.f32 %v1169_v48 }
 0x2d9   : > { %2088 = vtanh.f32 %v1172_v53  ;;  %v1669_v56 = vpop.f32.mrb[24].mxu1  ;;  %v2083_v62 = vpop.eup %2082 }
 0x2da   : > { %v1670_v4 = vpop.f32.mrb[25].mxu1 }
 0x2db   : > { %v2085_v5 = vpop.eup %2084  ;;  %v1671_v6 = vadd.f32 %v1670_v4, %v1669_v56  ;;  %v1672_v8 = vpop.f32.mrb[26].mxu1 }
 0x2dc   : > { %v1673_v9 = vpop.f32.mrb[27].mxu1  ;;  %v1239_v10 = vpack.c.bf16 %v2085_v5, %v2083_v62 }
 0x2dd   : > { %v1177_v11 = vadd.f32 %v1671_v6, %v2825_v12  ;;  %v1674_v14 = vadd.f32 %v1673_v9, %v1672_v8 }
 0x2de   : > { %1737 = vmatprep.mubr.bf16.mxu1 %v1239_v10 }
 0x2df   : > { %v1180_v16 = vadd.f32 %v1674_v14, %v2825_v12  ;;  %2090 = vtanh.f32 %v1177_v11  ;;  %v1626_v14 = vld [vmem:[%s2922_s6] ss:$0 sm:$0xff] }
 0x2e1   : > { %2092 = vtanh.f32 %v1180_v16  ;;  %v1675_v17 = vpop.f32.mrb[28].mxu1  ;;  %v2087_v19 = vpop.eup %2086 }
 0x2e2   : > { %v1676_v20 = vpop.f32.mrb[29].mxu1 }
 0x2e3   : > { %v2089_v25 = vpop.eup %2088  ;;  %v1677_v28 = vadd.f32 %v1676_v20, %v1675_v17  ;;  %v1678_v29 = vpop.f32.mrb[30].mxu1 }
 0x2e4   : > { %v1679_v31 = vpop.f32.mrb[31].mxu1  ;;  %v1240_v34 = vpack.c.bf16 %v2089_v25, %v2087_v19 }
 0x2e5   : > { %v1185_v35 = vadd.f32 %v1677_v28, %v2825_v12  ;;  %v1680_v36 = vadd.f32 %v1679_v31, %v1678_v29 }
 0x2e6   : > { %1738 = vmatmul.mubr.bf16.vlgmr.msra.gmra.mrb[48].mxu1 %v1240_v34 }
 0x2e7   : > { %v1188_v23 = vadd.f32 %v1680_v36, %v2825_v12  ;;  %2094 = vtanh.f32 %v1185_v35 }
 0x2e9   : > { %2096 = vtanh.f32 %v1188_v23  ;;  %v1681_v40 = vpop.f32.mrb[32].mxu1  ;;  %v2091_v41 = vpop.eup %2090 }
 0x2ea   : > { %v1682_v24 = vpop.f32.mrb[33].mxu1 }
 0x2eb   : > { %v2093_v26 = vpop.eup %2092  ;;  %v1683_v43 = vadd.f32 %v1682_v24, %v1681_v40  ;;  %v1684_v44 = vpop.f32.mrb[34].mxu1 }
 0x2ec   : > { %v1685_v22 = vpop.f32.mrb[35].mxu1  ;;  %v1241_v46 = vpack.c.bf16 %v2093_v26, %v2091_v41 }
 0x2ed   : > { %v1193_v49 = vadd.f32 %v1683_v43, %v2825_v12  ;;  %v1686_v51 = vadd.f32 %v1685_v22, %v1684_v44 }
 0x2ee   : > { %1741 = vmatprep.mubr.bf16.mxu1 %v1241_v46 }
 0x2ef   : > { %v1196_v52 = vadd.f32 %v1686_v51, %v2825_v12  ;;  %2098 = vtanh.f32 %v1193_v49 }
 0x2f1   : > { %2100 = vtanh.f32 %v1196_v52  ;;  %v1687_v54 = vpop.f32.mrb[36].mxu1  ;;  %v2095_v55 = vpop.eup %2094 }
 0x2f2   : > { %v1688_v57 = vpop.f32.mrb[37].mxu1 }
 0x2f3   : > { %v2097_v60 = vpop.eup %2096  ;;  %v1689_v63 = vadd.f32 %v1688_v57, %v1687_v54  ;;  %v1690_v32 = vpop.f32.mrb[38].mxu1 }
 0x2f4   : > { %v1691_v2 = vpop.f32.mrb[39].mxu1  ;;  %v1242_v0 = vpack.c.bf16 %v2097_v60, %v2095_v55 }
 0x2f5   : > { %v1201_v33 = vadd.f32 %v1689_v63, %v2825_v12  ;;  %v1692_v58 = vadd.f32 %v1691_v2, %v1690_v32 }
 0x2f6   : > { %1742 = vmatmul.mubr.bf16.gmra.mrb[52].mxu1 %v1242_v0 }
 0x2f7   : > { %v1204_v59 = vadd.f32 %v1692_v58, %v2825_v12  ;;  %2102 = vtanh.f32 %v1201_v33 }
 0x2f9   : > { %2104 = vtanh.f32 %v1204_v59  ;;  %v1693_v61 = vpop.f32.mrb[40].mxu1  ;;  %v2099_v1 = vpop.eup %2098 }
 0x2fa   : > { %v1694_v3 = vpop.f32.mrb[41].mxu1 }
 0x2fb   : > { %v2101_v7 = vpop.eup %2100  ;;  %v1695_v13 = vadd.f32 %v1694_v3, %v1693_v61  ;;  %v1696_v15 = vpop.f32.mrb[42].mxu1 }
 0x2fc   : > { %v1697_v18 = vpop.f32.mrb[43].mxu1  ;;  %v1243_v21 = vpack.c.bf16 %v2101_v7, %v2099_v1 }
 0x2fd   : > { %v1209_v30 = vadd.f32 %v1695_v13, %v2825_v12  ;;  %v1698_v37 = vadd.f32 %v1697_v18, %v1696_v15 }
 0x2fe   : > { %1745 = vmatprep.mubr.bf16.mxu1 %v1243_v21 }
 0x2ff   : > { %v1212_v38 = vadd.f32 %v1698_v37, %v2825_v12  ;;  %2106 = vtanh.f32 %v1209_v30 }
 0x301   : > { %2108 = vtanh.f32 %v1212_v38  ;;  %v1699_v39 = vpop.f32.mrb[44].mxu1  ;;  %v2103_v42 = vpop.eup %2102 }
 0x302   : > { %v1700_v27 = vpop.f32.mrb[45].mxu1 }
 0x303   : > { %v2105_v45 = vpop.eup %2104  ;;  %v1701_v47 = vadd.f32 %v1700_v27, %v1699_v39  ;;  %v1702_v48 = vpop.f32.mrb[46].mxu1 }
 0x304   : > { %v1703_v50 = vpop.f32.mrb[47].mxu1  ;;  %v1244_v53 = vpack.c.bf16 %v2105_v45, %v2103_v42 }
 0x305   : > { %v1217_v56 = vadd.f32 %v1701_v47, %v2825_v12  ;;  %v1704_v62 = vadd.f32 %v1703_v50, %v1702_v48 }
 0x306   : > { %1746 = vmatmul.mubr.bf16.gmra.mrb[56].mxu1 %v1244_v53 }
 0x307   : > { %v1220_v4 = vadd.f32 %v1704_v62, %v2825_v12  ;;  %2110 = vtanh.f32 %v1217_v56 }
 0x309   : > { %2112 = vtanh.f32 %v1220_v4  ;;  %v2107_v5 = vpop.eup %2106 }
 0x30b   : > { %v2109_v6 = vpop.eup %2108 }
 0x30c   : > { %v1245_v8 = vpack.c.bf16 %v2109_v6, %v2107_v5 }
 0x30e   : > { %1749 = vmatprep.mubr.bf16.mxu1 %v1245_v8 }
 0x311   : > { %v2111_v9 = vpop.eup %2110 }
 0x313   : > { %v2113_v10 = vpop.eup %2112 }
 0x314   : > { %v1246_v11 = vpack.c.bf16 %v2113_v10, %v2111_v9 }
 0x316   : > { %1750 = vmatmul.mubr.bf16.gmra.mrb[60].mxu1 %v1246_v11 }
 0x3b9   : > { %v1739_v16 = vpop.f32.mrb[48].mxu1 }
 0x3ba   : > { %v1361_v17 = vadd.f32 %v1739_v16, %v1626_v14  ;;  %v1352_v19 = vpop.f32.mrb[49].mxu1 }
 0x3bb   : > { %v1353_v20 = vadd.f32 %v1626_v14, %v1352_v19  ;;  %v1740_v12 = vpop.f32.mrb[50].mxu1 }
 0x3bc   : > { %1417 = vst [vmem:[%s2847_s21 + $0x10] sm:$0xff] %v1361_v17  ;;  %v1364_v25 = vadd.f32 %v1740_v12, %v1626_v14  ;;  %v1355_v28 = vpop.f32.mrb[51].mxu1 }
 0x3bd   : > { %1415 = vst [vmem:[%s2847_s21] sm:$0xff] %v1353_v20  ;;  %v1356_v29 = vadd.f32 %v1626_v14, %v1355_v28 }
 0x3be   : > { %1418 = vst [vmem:[%s2847_s21 + $0x18] sm:$0xff] %v1364_v25 }
 0x3bf   : > { %1416 = vst [vmem:[%s2847_s21 + $0x8] sm:$0xff] %v1356_v29 }
 0x3c9   : > { %v1743_v31 = vpop.f32.mrb[52].mxu1 }
 0x3ca   : > { %v1377_v34 = vadd.f32 %v1743_v31, %v1626_v14  ;;  %v1368_v35 = vpop.f32.mrb[53].mxu1 }
 0x3cb   : > { %v1369_v36 = vadd.f32 %v1626_v14, %v1368_v35  ;;  %v1744_v23 = vpop.f32.mrb[54].mxu1 }
 0x3cc   : > { %1421 = vst [vmem:[%s2847_s21 + $0x30] sm:$0xff] %v1377_v34  ;;  %v1380_v40 = vadd.f32 %v1744_v23, %v1626_v14  ;;  %v1371_v41 = vpop.f32.mrb[55].mxu1 }
 0x3cd   : > { %1419 = vst [vmem:[%s2847_s21 + $0x20] sm:$0xff] %v1369_v36  ;;  %v1372_v24 = vadd.f32 %v1626_v14, %v1371_v41 }
 0x3ce   : > { %1422 = vst [vmem:[%s2847_s21 + $0x38] sm:$0xff] %v1380_v40 }
 0x3cf   : > { %1420 = vst [vmem:[%s2847_s21 + $0x28] sm:$0xff] %v1372_v24 }
 0x3d9   : > { %v1747_v26 = vpop.f32.mrb[56].mxu1 }
 0x3da   : > { %v1393_v43 = vadd.f32 %v1747_v26, %v1626_v14  ;;  %v1384_v44 = vpop.f32.mrb[57].mxu1 }
 0x3db   : > { %v1385_v22 = vadd.f32 %v1626_v14, %v1384_v44  ;;  %v1748_v46 = vpop.f32.mrb[58].mxu1 }
 0x3dc   : > { %1425 = vst [vmem:[%s2847_s21 + $0x50] sm:$0xff] %v1393_v43  ;;  %v1396_v49 = vadd.f32 %v1748_v46, %v1626_v14  ;;  %v1387_v51 = vpop.f32.mrb[59].mxu1 }
 0x3dd   : > { %1423 = vst [vmem:[%s2847_s21 + $0x40] sm:$0xff] %v1385_v22  ;;  %v1388_v52 = vadd.f32 %v1626_v14, %v1387_v51 }
 0x3de   : > { %1426 = vst [vmem:[%s2847_s21 + $0x58] sm:$0xff] %v1396_v49 }
 0x3df   : > { %1424 = vst [vmem:[%s2847_s21 + $0x48] sm:$0xff] %v1388_v52 }
 0x3e9   : > { %v1751_v54 = vpop.f32.mrb[60].mxu1 }
 0x3ea   : > { %v1409_v55 = vadd.f32 %v1751_v54, %v1626_v14  ;;  %v1400_v57 = vpop.f32.mrb[61].mxu1 }
 0x3eb   : > { %v1401_v60 = vadd.f32 %v1626_v14, %v1400_v57  ;;  %v1752_v63 = vpop.f32.mrb[62].mxu1 }
 0x3ec   : > { %1429 = vst [vmem:[%s2847_s21 + $0x70] sm:$0xff] %v1409_v55  ;;  %v1412_v32 = vadd.f32 %v1752_v63, %v1626_v14  ;;  %v1403_v2 = vpop.f32.mrb[63].mxu1 }
 0x3ed   : > { %1427 = vst [vmem:[%s2847_s21 + $0x60] sm:$0xff] %v1401_v60  ;;  %v1404_v0 = vadd.f32 %v1626_v14, %v1403_v2 }
 0x3ee   : > { %1430 = vst [vmem:[%s2847_s21 + $0x78] sm:$0xff] %v1412_v32 }
 0x3ef   : > { %1428 = vst [vmem:[%s2847_s21 + $0x68] sm:$0xff] %v1404_v0 }
 0x3f0   : > { %2241 = shalt.err (!%p2238_p4)
}
 0x3f1   : > { %s2242_s29 = scalar_lea.hbm %s2867_s8, 2048  ;;  %s2246_s14 = scalar_lea.hbm %s2923_s7, 4096 }
 0x3f2   : > { %p2243_p9 = scmp.ne.s32.totalorder %s2867_s8, %s2242_s29  ;;  %p2247_p8 = scmp.lt.u32.totalorder %s2867_s8, %s2923_s7 }
 0x3f3   : > { %p2248_p13 = scmp.lt.u32.totalorder %s2246_s14, %s2242_s29  ;;  %p2250_p10 = scmp.lt.u32.totalorder %s2242_s29, %s2867_s8 }
 0x3f4   : > { %p2244_p0 = pnand %p2243_p9, %p2500_p5 }
 0x3f5   : > { %p2249_p6 = por %p2248_p13, %p2247_p8 }
 0x3f6   : > { %p2245_p11 = pneg %p2244_p0 }
 0x3f7   : > { %p2251_p3 = por %p2250_p10, %p2249_p6 }
 0x3f9   : > { %p2252_p7 = pnand %p2251_p3, %p2245_p11 }
 0x3fb   : > { %2255 = shalt.err (!%p2252_p7)
}
 0x3fc   : > { %s2316_s23 = smov 128   ;;  %s2317_s13 = smov 8  }
 0x3fd   : > { %1850 = dma.vmem_to_hbm [thread:$0]  (%p2500_p5), %s2869_s17, 2048, %s2867_s8, %s1432_s28, %s2316_s23, %s2316_s23, %s2317_s13  }
 0x3fe PF: > { %s2945_s15 = sld [smem:[#allocation15_spill]]  ;;  %s1460_s19 = sand.u32 1, %s2290_s24  }
 0x3ff   : > { %p2947_p2 = scmp.ge.s32.totalorder %s2302_s27, 2  ;;  %s1461_s22 = scalar_lea.sflag [#allocation4], %s1460_s19 }
 0x404   : > { %p2946_p12 = scmp.ne.s32.totalorder %s2945_s15, 0 }
 0x406   : > { %p1867_p1 = pnand %p2947_p2, %p2946_p12 }
 0x408   : > { %2285 = dma.done.wait (!%p1867_p1), %s1461_s22, 2048  }
 0x409   : > { %2287 = vsyncadd (!%p1867_p1), %s1461_s22, 4294965248  ;;  %p22_p4 = scmp.ge.s32.totalorder %s2468_s18, 4   ;;  %s2948_s24 = smov %s2294_s25 }
 0x40a   : > { %s2949_s25 = smov %s2298_s26  ;;  %s2950_s26 = smov %s2496_s12 }
 0x40b   : > { %s2951_s27 = smov %s2468_s18  ;;  %24 = sbr.rel (!%p22_p4) target bundleno = 9 (0x9), region = 105 }
 0x412   :  { %1466 = vsyncpa [#allocation3], 1 }
 0x413   :  { %1468 = vsyncpa [#allocation3 + $0x1], 1 }
 0x414   :  { %1469 = vsyncpa [#allocation6], 1 }
 0x415   :  { %1470 = vsyncpa [#allocation9], 1 }
 0x416   :  { %1471 = vsyncpa [#allocation4], 1 }
 0x417   :  { %1473 = vsyncpa [#allocation4 + $0x1], 1 }

</bundles_post_ra>
